<compile_context>
chip_gen: v7x
topology: tpu7x:2x2x1
jax: 0.10.0
libtpu: 0.0.40
codegen_flags: <defaults>
</compile_context>

<pallas_src>
import jax
import jax.numpy as jnp
from jax.experimental import pallas as pl
from jax.experimental.pallas import tpu as pltpu

# ----------------------------- sizes (small) ---------------------------------
BZ = 2          # batch
VOCAB = 50      # vocab_size
DOC = 16        # doc_len
WIN = 5         # l_window_size
L_OUT = 16      # l_out_size
G_OUT = 8       # g_out_size
EMB = 32        # emb_size
H1 = 64         # hidden_size_1
H2 = 16         # hidden_size_2
KS = (2, 3, 4)  # global-attention conv kernel heights
PAD = (WIN - 1) // 2
FC_IN = L_OUT + 3 * G_OUT

# im2col layout: doc-offsets -PAD .. +max(KS)-1 concatenated along the lane axis
NOFF = PAD + max(KS)            # 6 offset blocks  -> im2col width 6*EMB = 192
POST = NOFF - 1 - PAD           # zero rows appended after each document
assert WIN <= NOFF

# column layout of the fused conv weight/bias slab
COL_SCORE = 0                                   # local-attention logit
COL_LOC = 1                                     # local CNN (L_OUT cols)
COL_G = tuple(1 + L_OUT + i * G_OUT for i in range(len(KS)))
GATT_COL = 1 + L_OUT + len(KS) * G_OUT          # global-att bias parked here (=41)
NCOL = 48                                       # padded column count
OUT_LANES = 128                                 # lane-dense output width

F32 = jnp.float32


# ------------------------------ fused kernel ----------------------------------
def _dualatt_kernel(x_ref, wbig_ref, bbig_ref, gattw_ref,
                    w1_ref, b1_ref, w2_ref, b2_ref, out_ref):
    x = x_ref[...].astype(F32)                           # [2, BZ, DOC, EMB]
    S = 2 * BZ
    x4 = x.reshape(S, DOC, EMB)                          # docs folded on sublanes

    # im2col: row (n, d) holds x[n, d-PAD .. d+POST] (zeros outside the doc)
    xp = jnp.concatenate(
        [jnp.zeros((S, PAD, EMB), F32), x4, jnp.zeros((S, POST, EMB), F32)],
        axis=1)                                          # [S, DOC+NOFF-1, EMB]
    x6 = jnp.concatenate([xp[:, j:j + DOC, :] for j in range(NOFF)],
                         axis=2)                         # [S, DOC, NOFF*EMB]

    feats = []
    for s in range(2):                                   # 0 = user, 1 = item
        xs6 = x6[s * BZ:(s + 1) * BZ].reshape(BZ * DOC, NOFF * EMB)   # [BZ*DOC, 192]
        b = bbig_ref[s]                                  # [1, NCOL]
        # ONE fused GEMM: local-att logits + local-CNN pre + all global-conv pre
        p = jnp.dot(xs6, wbig_ref[s], preferred_element_type=F32)      # [BZ*DOC, NCOL]

        # ----- local attention -----
        score = jax.nn.sigmoid(p[:, COL_SCORE:COL_SCORE + 1]
                               + b[:, COL_SCORE:COL_SCORE + 1])         # [BZ*DOC, 1]
        zloc = jnp.tanh(p[:, COL_LOC:COL_LOC + L_OUT] * score
                        + b[:, COL_LOC:COL_LOC + L_OUT])                # [BZ*DOC, L_OUT]
        local = jnp.max(zloc.reshape(BZ, DOC, L_OUT), axis=1)           # [BZ, L_OUT]

        # ----- global attention scalar score -----
        xs = x[s]                                                       # [BZ, DOC, EMB]
        gsum = jnp.sum(jnp.sum(xs * gattw_ref[s][None], axis=2, keepdims=True),
                       axis=1, keepdims=True)                           # [BZ, 1, 1]
        gs = jax.nn.sigmoid(gsum + b[:, GATT_COL:GATT_COL + 1][None])   # [BZ, 1, 1]

        p3 = p.reshape(BZ, DOC, NCOL)
        didx = jax.lax.broadcasted_iota(jnp.int32, (BZ, DOC, G_OUT), 1)
        segs = [local]
        for i, k in enumerate(KS):
            off = COL_G[i]
            gk = jnp.tanh(p3[:, :, off:off + G_OUT] * gs
                          + b[:, off:off + G_OUT][None])                # [BZ, DOC, G_OUT]
            gk = jnp.where(didx < DOC - k + 1, gk, -2.0)   # mask invalid conv rows
            segs.append(jnp.max(gk, axis=1))                            # [BZ, G_OUT]
        feats.append(jnp.concatenate(segs, axis=1))                     # [BZ, FC_IN]

    # ----- shared FC tower on stacked user/item features, then rating dot -----
    f_all = jnp.concatenate(feats, axis=0)                              # [2*BZ, FC_IN]
    h = jnp.maximum(jnp.dot(f_all, w1_ref[...], preferred_element_type=F32)
                    + b1_ref[...], 0.0)                                 # [2*BZ, H1]
    # Dropout: identity (eval mode)  # TODO(synk): training-mode dropout
    o = jnp.dot(h, w2_ref[...], preferred_element_type=F32) + b2_ref[...]  # [2*BZ, H2]
    ratings = jnp.sum(o[0:BZ] * o[BZ:2 * BZ], axis=1, keepdims=True)    # [BZ, 1]
    # single lane-dense store
    out_ref[...] = jnp.broadcast_to(ratings, (BZ, OUT_LANES)).astype(out_ref.dtype)


# ------------------------- weight-slab construction ---------------------------
def build_side_slab(side_params):
    """Pack one side's conv weights/biases into the fused im2col weight slab."""
    (l_attw, l_attb, l_cnnw, l_cnnb, g_attw, g_attb, gws, gbs) = side_params
    W = jnp.zeros((NOFF * EMB, NCOL), F32)
    for w in range(WIN):                      # local-att conv tap w -> doc offset w-PAD
        W = W.at[w * EMB:(w + 1) * EMB, COL_SCORE].set(l_attw[:, w])
    W = W.at[PAD * EMB:(PAD + 1) * EMB, COL_LOC:COL_LOC + L_OUT].set(l_cnnw)
    for i, k in enumerate(KS):
        for w in range(k):                    # global conv_k tap w -> doc offset w
            W = W.at[(PAD + w) * EMB:(PAD + w + 1) * EMB,
                     COL_G[i]:COL_G[i] + G_OUT].set(gws[i][w])
    b = jnp.zeros((1, NCOL), F32)
    b = b.at[0, COL_SCORE].set(l_attb[0, 0])
    b = b.at[0, COL_LOC:COL_LOC + L_OUT].set(l_cnnb[0])
    for i in range(len(KS)):
        b = b.at[0, COL_G[i]:COL_G[i] + G_OUT].set(gbs[i][0])
    b = b.at[0, GATT_COL].set(g_attb[0, 0])
    return W, b


# ------------------------------ forward wrapper --------------------------------
@jax.jit
def dual_att_forward(u_docs, i_docs, emb_table, u_params, i_params, fc_params):
    # embedding lookup (gather) kept as JAX glue
    u_emb = jnp.take(emb_table, u_docs, axis=0)          # [BZ, DOC, EMB]
    i_emb = jnp.take(emb_table, i_docs, axis=0)          # [BZ, DOC, EMB]
    x_all = jnp.stack([u_emb, i_emb])                    # [2, BZ, DOC, EMB]

    wu, bu = build_side_slab(u_params)
    wi, bi = build_side_slab(i_params)
    wbig = jnp.stack([wu, wi])                           # [2, NOFF*EMB, NCOL]
    bbig = jnp.stack([bu, bi])                           # [2, 1, NCOL]
    gattw = jnp.stack([u_params[4], i_params[4]])        # [2, DOC, EMB]
    w1, b1, w2, b2 = fc_params

    vmem = lambda: pl.BlockSpec(memory_space=pltpu.MemorySpace.VMEM)
    out = pl.pallas_call(
        _dualatt_kernel,
        out_shape=jax.ShapeDtypeStruct((BZ, OUT_LANES), F32),
        in_specs=[vmem() for _ in range(8)],
        out_specs=vmem(),
    )(x_all, wbig, bbig, gattw, w1, b1, w2, b2)
    return out[:, 0]                                     # [BZ]


# ----------------------------- parameters ------------------------------------
def make_side_params(key):
    ks = jax.random.split(key, 8 + len(KS) * 2)
    l_attw = 0.1 * jax.random.normal(ks[0], (EMB, WIN), F32)
    l_attb = 0.1 * jax.random.normal(ks[1], (1, 1), F32)
    l_cnnw = 0.1 * jax.random.normal(ks[2], (EMB, L_OUT), F32)
    l_cnnb = 0.1 * jax.random.normal(ks[3], (1, L_OUT), F32)
    g_attw = 0.1 * jax.random.normal(ks[4], (DOC, EMB), F32)
    g_attb = 0.1 * jax.random.normal(ks[5], (1, 1), F32)
    gws, gbs = [], []
    for i, k in enumerate(KS):
        gws.append(0.1 * jax.random.normal(ks[6 + 2 * i], (k, EMB, G_OUT), F32))
        gbs.append(0.1 * jax.random.normal(ks[7 + 2 * i], (1, G_OUT), F32))
    return (l_attw, l_attb, l_cnnw, l_cnnb, g_attw, g_attb, tuple(gws), tuple(gbs))


# -------------------------- pure-JAX reference -------------------------------
def ref_features(emb, side_params):
    (l_attw, l_attb, l_cnnw, l_cnnb, g_attw, g_attb, gws, gbs) = side_params
    hp = jax.lax.Precision.HIGHEST
    xp = jnp.pad(emb, ((0, 0), (PAD, PAD), (0, 0)))
    logits = jnp.zeros((BZ, DOC), F32)
    for w in range(WIN):
        logits = logits + jnp.einsum('bde,e->bd', xp[:, w:w + DOC, :],
                                     l_attw[:, w], precision=hp)
    score = jax.nn.sigmoid(logits + l_attb[0, 0])[..., None]
    xw = emb * score
    z = jnp.tanh(jnp.einsum('bde,eo->bdo', xw, l_cnnw, precision=hp) + l_cnnb[0])
    local = z.max(axis=1)
    gs = jax.nn.sigmoid(jnp.sum(emb * g_attw[None], axis=(1, 2)) + g_attb[0, 0])
    y = emb * gs[:, None, None]
    gouts = []
    for ki, k in enumerate(KS):
        L = DOC - k + 1
        acc = jnp.zeros((BZ, L, G_OUT), F32)
        for w in range(k):
            acc = acc + jnp.einsum('bde,eo->bdo', y[:, w:w + L, :], gws[ki][w],
                                   precision=hp)
        gouts.append(jnp.tanh(acc + gbs[ki][0]).max(axis=1))
    return jnp.concatenate([local] + gouts, axis=1)


def ref_forward(u_emb, i_emb, u_p, i_p, fc_params):
    w1, b1, w2, b2 = fc_params
    hp = jax.lax.Precision.HIGHEST

    def mlp(f):
        h = jnp.maximum(jnp.dot(f, w1, precision=hp) + b1, 0.0)
        return jnp.dot(h, w2, precision=hp) + b2

    uf = mlp(ref_features(u_emb, u_p))
    it = mlp(ref_features(i_emb, i_p))
    return jnp.sum(uf * it, axis=1)


# ---------------------------------- main --------------------------------------
if __name__ == "__main__":
    key = jax.random.PRNGKey(0)
    k_emb, k_u, k_i, k_fc1, k_fc2, k_fc3, k_fc4, k_ud, k_id = jax.random.split(key, 9)

    emb_table = 0.3 * jax.random.normal(k_emb, (VOCAB, EMB), F32)
    u_params = make_side_params(k_u)
    i_params = make_side_params(k_i)
    fc_params = (0.1 * jax.random.normal(k_fc1, (FC_IN, H1), F32),
                 0.1 * jax.random.normal(k_fc2, (1, H1), F32),
                 0.1 * jax.random.normal(k_fc3, (H1, H2), F32),
                 0.1 * jax.random.normal(k_fc4, (1, H2), F32))

    u_docs = jax.random.randint(k_ud, (BZ, DOC), 0, VOCAB, dtype=jnp.int32)
    i_docs = jax.random.randint(k_id, (BZ, DOC), 0, VOCAB, dtype=jnp.int32)

    ratings = dual_att_forward(u_docs, i_docs, emb_table,
                               u_params, i_params, fc_params)      # [BZ]
    ratings = jax.block_until_ready(ratings)

    u_emb = jnp.take(emb_table, u_docs, axis=0)
    i_emb = jnp.take(emb_table, i_docs, axis=0)
    ref = ref_forward(u_emb, i_emb, u_params, i_params, fc_params)

    assert ratings.shape == (BZ,)
    assert jnp.allclose(ratings, ref, rtol=5e-3, atol=5e-3), (ratings, ref)

    print("KERNEL_OK")
</pallas_src>

<mosaic_0001>
module attributes {stable_mosaic.version = 11 : i64} {
  func.func @_dualatt_kernel(%arg0: memref<2x2x16x32xf32, #tpu.memory_space<vmem>>, %arg1: memref<2x192x48xf32, #tpu.memory_space<vmem>>, %arg2: memref<2x1x48xf32, #tpu.memory_space<vmem>>, %arg3: memref<2x16x32xf32, #tpu.memory_space<vmem>>, %arg4: memref<40x64xf32, #tpu.memory_space<vmem>>, %arg5: memref<1x64xf32, #tpu.memory_space<vmem>>, %arg6: memref<64x16xf32, #tpu.memory_space<vmem>>, %arg7: memref<1x16xf32, #tpu.memory_space<vmem>>, %arg8: memref<2x128xf32, #tpu.memory_space<vmem>>) attributes {dimension_semantics = [], scalar_prefetch = 0 : i64, scratch_operands = 0 : i64, tpu.core_type = #tpu.core_type<tc>} {
    %c0 = arith.constant 0 : index
    %c0_0 = arith.constant 0 : index
    %c0_1 = arith.constant 0 : index
    %c0_2 = arith.constant 0 : index
    %0 = vector.load %arg0[%c0, %c0_0, %c0_1, %c0_2] : memref<2x2x16x32xf32, #tpu.memory_space<vmem>>, vector<2x2x16x32xf32>
    %1 = vector.shape_cast %0 : vector<2x2x16x32xf32> to vector<4x16x32xf32>
    %cst = arith.constant 0.000000e+00 : f32
    %2 = vector.broadcast %cst : f32 to vector<4x2x32xf32>
    %cst_3 = arith.constant 0.000000e+00 : f32
    %3 = vector.broadcast %cst_3 : f32 to vector<4x3x32xf32>
    %4 = tpu.concatenate %2, %1, %3 in 1 : vector<4x2x32xf32>, vector<4x16x32xf32>, vector<4x3x32xf32> -> vector<4x21x32xf32>
    %5 = vector.extract_strided_slice %4 {offsets = [0, 0, 0], sizes = [4, 16, 32], strides = [1, 1, 1]} : vector<4x21x32xf32> to vector<4x16x32xf32>
    %6 = vector.extract_strided_slice %4 {offsets = [0, 1, 0], sizes = [4, 16, 32], strides = [1, 1, 1]} : vector<4x21x32xf32> to vector<4x16x32xf32>
    %7 = vector.extract_strided_slice %4 {offsets = [0, 2, 0], sizes = [4, 16, 32], strides = [1, 1, 1]} : vector<4x21x32xf32> to vector<4x16x32xf32>
    %8 = vector.extract_strided_slice %4 {offsets = [0, 3, 0], sizes = [4, 16, 32], strides = [1, 1, 1]} : vector<4x21x32xf32> to vector<4x16x32xf32>
    %9 = vector.extract_strided_slice %4 {offsets = [0, 4, 0], sizes = [4, 16, 32], strides = [1, 1, 1]} : vector<4x21x32xf32> to vector<4x16x32xf32>
    %10 = vector.extract_strided_slice %4 {offsets = [0, 5, 0], sizes = [4, 16, 32], strides = [1, 1, 1]} : vector<4x21x32xf32> to vector<4x16x32xf32>
    %11 = tpu.concatenate %5, %6, %7, %8, %9, %10 in 2 : vector<4x16x32xf32>, vector<4x16x32xf32>, vector<4x16x32xf32>, vector<4x16x32xf32>, vector<4x16x32xf32>, vector<4x16x32xf32> -> vector<4x16x192xf32>
    %12 = vector.extract_strided_slice %11 {offsets = [0, 0, 0], sizes = [2, 16, 192], strides = [1, 1, 1]} : vector<4x16x192xf32> to vector<2x16x192xf32>
    %13 = vector.shape_cast %12 : vector<2x16x192xf32> to vector<32x192xf32>
    %c0_4 = arith.constant 0 : index
    %c0_5 = arith.constant 0 : index
    %c0_6 = arith.constant 0 : index
    %14 = vector.load %arg2[%c0_4, %c0_5, %c0_6] : memref<2x1x48xf32, #tpu.memory_space<vmem>>, vector<1x1x48xf32>
    %15 = vector.shape_cast %14 : vector<1x1x48xf32> to vector<1x48xf32>
    %c0_7 = arith.constant 0 : index
    %c0_8 = arith.constant 0 : index
    %c0_9 = arith.constant 0 : index
    %16 = vector.load %arg1[%c0_7, %c0_8, %c0_9] : memref<2x192x48xf32, #tpu.memory_space<vmem>>, vector<1x192x48xf32>
    %17 = vector.shape_cast %16 : vector<1x192x48xf32> to vector<192x48xf32>
    %cst_10 = arith.constant dense<0.000000e+00> : vector<32x48xf32>
    %18 = tpu.matmul %13, %17, %cst_10 {dimension_numbers = #tpu.dot_dimension_numbers<[1], [0], [0], [1], [0, 0, 1, 1], [], []>} : vector<32x192xf32>, vector<192x48xf32>, vector<32x48xf32> -> vector<32x48xf32>
    %19 = vector.extract_strided_slice %18 {offsets = [0, 0], sizes = [32, 1], strides = [1, 1]} : vector<32x48xf32> to vector<32x1xf32>
    %20 = vector.extract_strided_slice %15 {offsets = [0, 0], sizes = [1, 1], strides = [1, 1]} : vector<1x48xf32> to vector<1x1xf32>
    %21 = vector.broadcast %20 : vector<1x1xf32> to vector<32x1xf32>
    %22 = arith.addf %19, %21 : vector<32x1xf32>
    %23 = arith.negf %22 : vector<32x1xf32>
    %24 = math.exp %23 : vector<32x1xf32>
    %cst_11 = arith.constant 1.000000e+00 : f32
    %25 = vector.broadcast %cst_11 : f32 to vector<32x1xf32>
    %26 = arith.addf %25, %24 : vector<32x1xf32>
    %27 = arith.divf %25, %26 : vector<32x1xf32>
    %28 = vector.extract_strided_slice %18 {offsets = [0, 1], sizes = [32, 16], strides = [1, 1]} : vector<32x48xf32> to vector<32x16xf32>
    %29 = vector.broadcast %27 : vector<32x1xf32> to vector<32x16xf32>
    %30 = arith.mulf %28, %29 : vector<32x16xf32>
    %31 = vector.extract_strided_slice %15 {offsets = [0, 1], sizes = [1, 16], strides = [1, 1]} : vector<1x48xf32> to vector<1x16xf32>
    %32 = vector.broadcast %31 : vector<1x16xf32> to vector<32x16xf32>
    %33 = arith.addf %30, %32 : vector<32x16xf32>
    %34 = math.tanh %33 : vector<32x16xf32>
    %35 = vector.shape_cast %34 : vector<32x16xf32> to vector<2x16x16xf32>
    %cst_12 = arith.constant dense<0xFF800000> : vector<2x16xf32>
    %36 = vector.multi_reduction <maximumf>, %35, %cst_12 [1] : vector<2x16x16xf32> to vector<2x16xf32>
    %37 = vector.extract_strided_slice %0 {offsets = [0, 0, 0, 0], sizes = [1, 2, 16, 32], strides = [1, 1, 1, 1]} : vector<2x2x16x32xf32> to vector<1x2x16x32xf32>
    %38 = vector.shape_cast %37 : vector<1x2x16x32xf32> to vector<2x16x32xf32>
    %c0_13 = arith.constant 0 : index
    %c0_14 = arith.constant 0 : index
    %c0_15 = arith.constant 0 : index
    %39 = vector.load %arg3[%c0_13, %c0_14, %c0_15] : memref<2x16x32xf32, #tpu.memory_space<vmem>>, vector<1x16x32xf32>
    %40 = vector.shape_cast %39 : vector<1x16x32xf32> to vector<16x32xf32>
    %41 = vector.shape_cast %40 : vector<16x32xf32> to vector<1x16x32xf32>
    %42 = vector.broadcast %41 : vector<1x16x32xf32> to vector<2x16x32xf32>
    %43 = arith.mulf %38, %42 : vector<2x16x32xf32>
    %cst_16 = arith.constant dense<0.000000e+00> : vector<2x16xf32>
    %44 = vector.multi_reduction <add>, %43, %cst_16 [2] : vector<2x16x32xf32> to vector<2x16xf32>
    %45 = vector.shape_cast %44 : vector<2x16xf32> to vector<2x16x1xf32>
    %cst_17 = arith.constant dense<0.000000e+00> : vector<2x1xf32>
    %46 = vector.multi_reduction <add>, %45, %cst_17 [1] : vector<2x16x1xf32> to vector<2x1xf32>
    %47 = vector.shape_cast %46 : vector<2x1xf32> to vector<2x1x1xf32>
    %48 = vector.extract_strided_slice %15 {offsets = [0, 41], sizes = [1, 1], strides = [1, 1]} : vector<1x48xf32> to vector<1x1xf32>
    %49 = vector.shape_cast %48 : vector<1x1xf32> to vector<1x1x1xf32>
    %50 = vector.broadcast %49 : vector<1x1x1xf32> to vector<2x1x1xf32>
    %51 = arith.addf %47, %50 : vector<2x1x1xf32>
    %52 = arith.negf %51 : vector<2x1x1xf32>
    %53 = math.exp %52 : vector<2x1x1xf32>
    %cst_18 = arith.constant 1.000000e+00 : f32
    %54 = vector.broadcast %cst_18 : f32 to vector<2x1x1xf32>
    %55 = arith.addf %54, %53 : vector<2x1x1xf32>
    %56 = arith.divf %54, %55 : vector<2x1x1xf32>
    %57 = vector.shape_cast %18 : vector<32x48xf32> to vector<2x16x48xf32>
    %58 = tpu.iota {dimensions = array<i32: 1>} : vector<2x16x8xi32>
    %59 = vector.extract_strided_slice %57 {offsets = [0, 0, 17], sizes = [2, 16, 8], strides = [1, 1, 1]} : vector<2x16x48xf32> to vector<2x16x8xf32>
    %60 = vector.broadcast %56 : vector<2x1x1xf32> to vector<2x16x8xf32>
    %61 = arith.mulf %59, %60 : vector<2x16x8xf32>
    %62 = vector.extract_strided_slice %15 {offsets = [0, 17], sizes = [1, 8], strides = [1, 1]} : vector<1x48xf32> to vector<1x8xf32>
    %63 = vector.shape_cast %62 : vector<1x8xf32> to vector<1x1x8xf32>
    %64 = vector.broadcast %63 : vector<1x1x8xf32> to vector<2x16x8xf32>
    %65 = arith.addf %61, %64 : vector<2x16x8xf32>
    %66 = math.tanh %65 : vector<2x16x8xf32>
    %c15_i32 = arith.constant 15 : i32
    %67 = vector.broadcast %c15_i32 : i32 to vector<2x16x8xi32>
    %68 = arith.cmpi slt, %58, %67 : vector<2x16x8xi32>
    %cst_19 = arith.constant -2.000000e+00 : f32
    %69 = vector.broadcast %cst_19 : f32 to vector<2x16x8xf32>
    %70 = arith.select %68, %66, %69 : vector<2x16x8xi1>, vector<2x16x8xf32>
    %cst_20 = arith.constant dense<0xFF800000> : vector<2x8xf32>
    %71 = vector.multi_reduction <maximumf>, %70, %cst_20 [1] : vector<2x16x8xf32> to vector<2x8xf32>
    %72 = vector.extract_strided_slice %57 {offsets = [0, 0, 25], sizes = [2, 16, 8], strides = [1, 1, 1]} : vector<2x16x48xf32> to vector<2x16x8xf32>
    %73 = vector.broadcast %56 : vector<2x1x1xf32> to vector<2x16x8xf32>
    %74 = arith.mulf %72, %73 : vector<2x16x8xf32>
    %75 = vector.extract_strided_slice %15 {offsets = [0, 25], sizes = [1, 8], strides = [1, 1]} : vector<1x48xf32> to vector<1x8xf32>
    %76 = vector.shape_cast %75 : vector<1x8xf32> to vector<1x1x8xf32>
    %77 = vector.broadcast %76 : vector<1x1x8xf32> to vector<2x16x8xf32>
    %78 = arith.addf %74, %77 : vector<2x16x8xf32>
    %79 = math.tanh %78 : vector<2x16x8xf32>
    %c14_i32 = arith.constant 14 : i32
    %80 = vector.broadcast %c14_i32 : i32 to vector<2x16x8xi32>
    %81 = arith.cmpi slt, %58, %80 : vector<2x16x8xi32>
    %cst_21 = arith.constant -2.000000e+00 : f32
    %82 = vector.broadcast %cst_21 : f32 to vector<2x16x8xf32>
    %83 = arith.select %81, %79, %82 : vector<2x16x8xi1>, vector<2x16x8xf32>
    %cst_22 = arith.constant dense<0xFF800000> : vector<2x8xf32>
    %84 = vector.multi_reduction <maximumf>, %83, %cst_22 [1] : vector<2x16x8xf32> to vector<2x8xf32>
    %85 = vector.extract_strided_slice %57 {offsets = [0, 0, 33], sizes = [2, 16, 8], strides = [1, 1, 1]} : vector<2x16x48xf32> to vector<2x16x8xf32>
    %86 = vector.broadcast %56 : vector<2x1x1xf32> to vector<2x16x8xf32>
    %87 = arith.mulf %85, %86 : vector<2x16x8xf32>
    %88 = vector.extract_strided_slice %15 {offsets = [0, 33], sizes = [1, 8], strides = [1, 1]} : vector<1x48xf32> to vector<1x8xf32>
    %89 = vector.shape_cast %88 : vector<1x8xf32> to vector<1x1x8xf32>
    %90 = vector.broadcast %89 : vector<1x1x8xf32> to vector<2x16x8xf32>
    %91 = arith.addf %87, %90 : vector<2x16x8xf32>
    %92 = math.tanh %91 : vector<2x16x8xf32>
    %c13_i32 = arith.constant 13 : i32
    %93 = vector.broadcast %c13_i32 : i32 to vector<2x16x8xi32>
    %94 = arith.cmpi slt, %58, %93 : vector<2x16x8xi32>
    %cst_23 = arith.constant -2.000000e+00 : f32
    %95 = vector.broadcast %cst_23 : f32 to vector<2x16x8xf32>
    %96 = arith.select %94, %92, %95 : vector<2x16x8xi1>, vector<2x16x8xf32>
    %cst_24 = arith.constant dense<0xFF800000> : vector<2x8xf32>
    %97 = vector.multi_reduction <maximumf>, %96, %cst_24 [1] : vector<2x16x8xf32> to vector<2x8xf32>
    %98 = tpu.concatenate %36, %71, %84, %97 in 1 : vector<2x16xf32>, vector<2x8xf32>, vector<2x8xf32>, vector<2x8xf32> -> vector<2x40xf32>
    %99 = vector.extract_strided_slice %11 {offsets = [2, 0, 0], sizes = [2, 16, 192], strides = [1, 1, 1]} : vector<4x16x192xf32> to vector<2x16x192xf32>
    %100 = vector.shape_cast %99 : vector<2x16x192xf32> to vector<32x192xf32>
    %c1 = arith.constant 1 : index
    %c0_25 = arith.constant 0 : index
    %c0_26 = arith.constant 0 : index
    %101 = vector.load %arg2[%c1, %c0_25, %c0_26] : memref<2x1x48xf32, #tpu.memory_space<vmem>>, vector<1x1x48xf32>
    %102 = vector.shape_cast %101 : vector<1x1x48xf32> to vector<1x48xf32>
    %c1_27 = arith.constant 1 : index
    %c0_28 = arith.constant 0 : index
    %c0_29 = arith.constant 0 : index
    %103 = vector.load %arg1[%c1_27, %c0_28, %c0_29] : memref<2x192x48xf32, #tpu.memory_space<vmem>>, vector<1x192x48xf32>
    %104 = vector.shape_cast %103 : vector<1x192x48xf32> to vector<192x48xf32>
    %cst_30 = arith.constant dense<0.000000e+00> : vector<32x48xf32>
    %105 = tpu.matmul %100, %104, %cst_30 {dimension_numbers = #tpu.dot_dimension_numbers<[1], [0], [0], [1], [0, 0, 1, 1], [], []>} : vector<32x192xf32>, vector<192x48xf32>, vector<32x48xf32> -> vector<32x48xf32>
    %106 = vector.extract_strided_slice %105 {offsets = [0, 0], sizes = [32, 1], strides = [1, 1]} : vector<32x48xf32> to vector<32x1xf32>
    %107 = vector.extract_strided_slice %102 {offsets = [0, 0], sizes = [1, 1], strides = [1, 1]} : vector<1x48xf32> to vector<1x1xf32>
    %108 = vector.broadcast %107 : vector<1x1xf32> to vector<32x1xf32>
    %109 = arith.addf %106, %108 : vector<32x1xf32>
    %110 = arith.negf %109 : vector<32x1xf32>
    %111 = math.exp %110 : vector<32x1xf32>
    %cst_31 = arith.constant 1.000000e+00 : f32
    %112 = vector.broadcast %cst_31 : f32 to vector<32x1xf32>
    %113 = arith.addf %112, %111 : vector<32x1xf32>
    %114 = arith.divf %112, %113 : vector<32x1xf32>
    %115 = vector.extract_strided_slice %105 {offsets = [0, 1], sizes = [32, 16], strides = [1, 1]} : vector<32x48xf32> to vector<32x16xf32>
    %116 = vector.broadcast %114 : vector<32x1xf32> to vector<32x16xf32>
    %117 = arith.mulf %115, %116 : vector<32x16xf32>
    %118 = vector.extract_strided_slice %102 {offsets = [0, 1], sizes = [1, 16], strides = [1, 1]} : vector<1x48xf32> to vector<1x16xf32>
    %119 = vector.broadcast %118 : vector<1x16xf32> to vector<32x16xf32>
    %120 = arith.addf %117, %119 : vector<32x16xf32>
    %121 = math.tanh %120 : vector<32x16xf32>
    %122 = vector.shape_cast %121 : vector<32x16xf32> to vector<2x16x16xf32>
    %cst_32 = arith.constant dense<0xFF800000> : vector<2x16xf32>
    %123 = vector.multi_reduction <maximumf>, %122, %cst_32 [1] : vector<2x16x16xf32> to vector<2x16xf32>
    %124 = vector.extract_strided_slice %0 {offsets = [1, 0, 0, 0], sizes = [1, 2, 16, 32], strides = [1, 1, 1, 1]} : vector<2x2x16x32xf32> to vector<1x2x16x32xf32>
    %125 = vector.shape_cast %124 : vector<1x2x16x32xf32> to vector<2x16x32xf32>
    %c1_33 = arith.constant 1 : index
    %c0_34 = arith.constant 0 : index
    %c0_35 = arith.constant 0 : index
    %126 = vector.load %arg3[%c1_33, %c0_34, %c0_35] : memref<2x16x32xf32, #tpu.memory_space<vmem>>, vector<1x16x32xf32>
    %127 = vector.shape_cast %126 : vector<1x16x32xf32> to vector<16x32xf32>
    %128 = vector.shape_cast %127 : vector<16x32xf32> to vector<1x16x32xf32>
    %129 = vector.broadcast %128 : vector<1x16x32xf32> to vector<2x16x32xf32>
    %130 = arith.mulf %125, %129 : vector<2x16x32xf32>
    %cst_36 = arith.constant dense<0.000000e+00> : vector<2x16xf32>
    %131 = vector.multi_reduction <add>, %130, %cst_36 [2] : vector<2x16x32xf32> to vector<2x16xf32>
    %132 = vector.shape_cast %131 : vector<2x16xf32> to vector<2x16x1xf32>
    %cst_37 = arith.constant dense<0.000000e+00> : vector<2x1xf32>
    %133 = vector.multi_reduction <add>, %132, %cst_37 [1] : vector<2x16x1xf32> to vector<2x1xf32>
    %134 = vector.shape_cast %133 : vector<2x1xf32> to vector<2x1x1xf32>
    %135 = vector.extract_strided_slice %102 {offsets = [0, 41], sizes = [1, 1], strides = [1, 1]} : vector<1x48xf32> to vector<1x1xf32>
    %136 = vector.shape_cast %135 : vector<1x1xf32> to vector<1x1x1xf32>
    %137 = vector.broadcast %136 : vector<1x1x1xf32> to vector<2x1x1xf32>
    %138 = arith.addf %134, %137 : vector<2x1x1xf32>
    %139 = arith.negf %138 : vector<2x1x1xf32>
    %140 = math.exp %139 : vector<2x1x1xf32>
    %cst_38 = arith.constant 1.000000e+00 : f32
    %141 = vector.broadcast %cst_38 : f32 to vector<2x1x1xf32>
    %142 = arith.addf %141, %140 : vector<2x1x1xf32>
    %143 = arith.divf %141, %142 : vector<2x1x1xf32>
    %144 = vector.shape_cast %105 : vector<32x48xf32> to vector<2x16x48xf32>
    %145 = tpu.iota {dimensions = array<i32: 1>} : vector<2x16x8xi32>
    %146 = vector.extract_strided_slice %144 {offsets = [0, 0, 17], sizes = [2, 16, 8], strides = [1, 1, 1]} : vector<2x16x48xf32> to vector<2x16x8xf32>
    %147 = vector.broadcast %143 : vector<2x1x1xf32> to vector<2x16x8xf32>
    %148 = arith.mulf %146, %147 : vector<2x16x8xf32>
    %149 = vector.extract_strided_slice %102 {offsets = [0, 17], sizes = [1, 8], strides = [1, 1]} : vector<1x48xf32> to vector<1x8xf32>
    %150 = vector.shape_cast %149 : vector<1x8xf32> to vector<1x1x8xf32>
    %151 = vector.broadcast %150 : vector<1x1x8xf32> to vector<2x16x8xf32>
    %152 = arith.addf %148, %151 : vector<2x16x8xf32>
    %153 = math.tanh %152 : vector<2x16x8xf32>
    %c15_i32_39 = arith.constant 15 : i32
    %154 = vector.broadcast %c15_i32_39 : i32 to vector<2x16x8xi32>
    %155 = arith.cmpi slt, %145, %154 : vector<2x16x8xi32>
    %cst_40 = arith.constant -2.000000e+00 : f32
    %156 = vector.broadcast %cst_40 : f32 to vector<2x16x8xf32>
    %157 = arith.select %155, %153, %156 : vector<2x16x8xi1>, vector<2x16x8xf32>
    %cst_41 = arith.constant dense<0xFF800000> : vector<2x8xf32>
    %158 = vector.multi_reduction <maximumf>, %157, %cst_41 [1] : vector<2x16x8xf32> to vector<2x8xf32>
    %159 = vector.extract_strided_slice %144 {offsets = [0, 0, 25], sizes = [2, 16, 8], strides = [1, 1, 1]} : vector<2x16x48xf32> to vector<2x16x8xf32>
    %160 = vector.broadcast %143 : vector<2x1x1xf32> to vector<2x16x8xf32>
    %161 = arith.mulf %159, %160 : vector<2x16x8xf32>
    %162 = vector.extract_strided_slice %102 {offsets = [0, 25], sizes = [1, 8], strides = [1, 1]} : vector<1x48xf32> to vector<1x8xf32>
    %163 = vector.shape_cast %162 : vector<1x8xf32> to vector<1x1x8xf32>
    %164 = vector.broadcast %163 : vector<1x1x8xf32> to vector<2x16x8xf32>
    %165 = arith.addf %161, %164 : vector<2x16x8xf32>
    %166 = math.tanh %165 : vector<2x16x8xf32>
    %c14_i32_42 = arith.constant 14 : i32
    %167 = vector.broadcast %c14_i32_42 : i32 to vector<2x16x8xi32>
    %168 = arith.cmpi slt, %145, %167 : vector<2x16x8xi32>
    %cst_43 = arith.constant -2.000000e+00 : f32
    %169 = vector.broadcast %cst_43 : f32 to vector<2x16x8xf32>
    %170 = arith.select %168, %166, %169 : vector<2x16x8xi1>, vector<2x16x8xf32>
    %cst_44 = arith.constant dense<0xFF800000> : vector<2x8xf32>
    %171 = vector.multi_reduction <maximumf>, %170, %cst_44 [1] : vector<2x16x8xf32> to vector<2x8xf32>
    %172 = vector.extract_strided_slice %144 {offsets = [0, 0, 33], sizes = [2, 16, 8], strides = [1, 1, 1]} : vector<2x16x48xf32> to vector<2x16x8xf32>
    %173 = vector.broadcast %143 : vector<2x1x1xf32> to vector<2x16x8xf32>
    %174 = arith.mulf %172, %173 : vector<2x16x8xf32>
    %175 = vector.extract_strided_slice %102 {offsets = [0, 33], sizes = [1, 8], strides = [1, 1]} : vector<1x48xf32> to vector<1x8xf32>
    %176 = vector.shape_cast %175 : vector<1x8xf32> to vector<1x1x8xf32>
    %177 = vector.broadcast %176 : vector<1x1x8xf32> to vector<2x16x8xf32>
    %178 = arith.addf %174, %177 : vector<2x16x8xf32>
    %179 = math.tanh %178 : vector<2x16x8xf32>
    %c13_i32_45 = arith.constant 13 : i32
    %180 = vector.broadcast %c13_i32_45 : i32 to vector<2x16x8xi32>
    %181 = arith.cmpi slt, %145, %180 : vector<2x16x8xi32>
    %cst_46 = arith.constant -2.000000e+00 : f32
    %182 = vector.broadcast %cst_46 : f32 to vector<2x16x8xf32>
    %183 = arith.select %181, %179, %182 : vector<2x16x8xi1>, vector<2x16x8xf32>
    %cst_47 = arith.constant dense<0xFF800000> : vector<2x8xf32>
    %184 = vector.multi_reduction <maximumf>, %183, %cst_47 [1] : vector<2x16x8xf32> to vector<2x8xf32>
    %185 = tpu.concatenate %123, %158, %171, %184 in 1 : vector<2x16xf32>, vector<2x8xf32>, vector<2x8xf32>, vector<2x8xf32> -> vector<2x40xf32>
    %186 = tpu.concatenate %98, %185 in 0 : vector<2x40xf32>, vector<2x40xf32> -> vector<4x40xf32>
    %c0_48 = arith.constant 0 : index
    %c0_49 = arith.constant 0 : index
    %187 = vector.load %arg4[%c0_48, %c0_49] : memref<40x64xf32, #tpu.memory_space<vmem>>, vector<40x64xf32>
    %cst_50 = arith.constant dense<0.000000e+00> : vector<4x64xf32>
    %188 = tpu.matmul %186, %187, %cst_50 {dimension_numbers = #tpu.dot_dimension_numbers<[1], [0], [0], [1], [0, 0, 1, 1], [], []>} : vector<4x40xf32>, vector<40x64xf32>, vector<4x64xf32> -> vector<4x64xf32>
    %c0_51 = arith.constant 0 : index
    %c0_52 = arith.constant 0 : index
    %189 = vector.load %arg5[%c0_51, %c0_52] : memref<1x64xf32, #tpu.memory_space<vmem>>, vector<1x64xf32>
    %190 = vector.broadcast %189 : vector<1x64xf32> to vector<4x64xf32>
    %191 = arith.addf %188, %190 : vector<4x64xf32>
    %cst_53 = arith.constant 0.000000e+00 : f32
    %192 = vector.broadcast %cst_53 : f32 to vector<4x64xf32>
    %193 = arith.maximumf %191, %192 : vector<4x64xf32>
    %c0_54 = arith.constant 0 : index
    %c0_55 = arith.constant 0 : index
    %194 = vector.load %arg6[%c0_54, %c0_55] : memref<64x16xf32, #tpu.memory_space<vmem>>, vector<64x16xf32>
    %cst_56 = arith.constant dense<0.000000e+00> : vector<4x16xf32>
    %195 = tpu.matmul %193, %194, %cst_56 {dimension_numbers = #tpu.dot_dimension_numbers<[1], [0], [0], [1], [0, 0, 1, 1], [], []>} : vector<4x64xf32>, vector<64x16xf32>, vector<4x16xf32> -> vector<4x16xf32>
    %c0_57 = arith.constant 0 : index
    %c0_58 = arith.constant 0 : index
    %196 = vector.load %arg7[%c0_57, %c0_58] : memref<1x16xf32, #tpu.memory_space<vmem>>, vector<1x16xf32>
    %197 = vector.broadcast %196 : vector<1x16xf32> to vector<4x16xf32>
    %198 = arith.addf %195, %197 : vector<4x16xf32>
    %199 = vector.extract_strided_slice %198 {offsets = [0, 0], sizes = [2, 16], strides = [1, 1]} : vector<4x16xf32> to vector<2x16xf32>
    %200 = vector.extract_strided_slice %198 {offsets = [2, 0], sizes = [2, 16], strides = [1, 1]} : vector<4x16xf32> to vector<2x16xf32>
    %201 = arith.mulf %199, %200 : vector<2x16xf32>
    %cst_59 = arith.constant dense<0.000000e+00> : vector<2xf32>
    %202 = vector.multi_reduction <add>, %201, %cst_59 [1] : vector<2x16xf32> to vector<2xf32>
    %203 = vector.shape_cast %202 : vector<2xf32> to vector<2x1xf32>
    %204 = vector.shape_cast %203 : vector<2x1xf32> to vector<2x1xf32>
    %205 = vector.broadcast %204 : vector<2x1xf32> to vector<2x128xf32>
    %c0_60 = arith.constant 0 : index
    %c0_61 = arith.constant 0 : index
    %206 = vector.load %arg8[%c0_60, %c0_61] : memref<2x128xf32, #tpu.memory_space<vmem>>, vector<2x128xf32>
    tpu.vector_store %arg8[%c0_60, %c0_61], %205 {strides = array<i32>} : memref<2x128xf32, #tpu.memory_space<vmem>>, vector<2x128xf32>,
    return
  }
}

</mosaic_0001>

<bundles_post_ra>
// kernel: dual_att_forward.1
= control target key start
LH: loop header
LB: loop body
LE: loop exit
PB: predicated region body
PF: predicated region fallthrough
CT: control target
= control target key end

     0   :  { %vm45_vm0 = vcmask 1041408   ;;  %vm250_vm1 = vcmask 1042432   ;;  %vm86_vm2 = vcmask 1046528   ;;  %vm176_vm3 = vcmask 1044480   ;;  %s1628_s15 = smov 32   ;;  %s1629_s18 = smov 96   ;;  %s2379_s0 = inlined_call_operand.vmem [shape: f32[2,2,16,32], index: 0, kind: input, shape index: {}]   ;;  %s2380_s1 = inlined_call_operand.vmem [shape: f32[2,192,48], index: 1, kind: input, shape index: {}]   ;;  %s2381_s3 = inlined_call_operand.vmem [shape: f32[2,16,32], index: 3, kind: input, shape index: {}]   ;;  %s2382_s2 = inlined_call_operand.vmem [shape: f32[2,1,48], index: 2, kind: input, shape index: {}]   ;;  %s2383_s4 = inlined_call_operand.vmem [shape: f32[40,64], index: 4, kind: input, shape index: {}]   ;;  %s2384_s6 = inlined_call_operand.vmem [shape: f32[64,16], index: 6, kind: input, shape index: {}]   ;;  %s2385_s5 = inlined_call_operand.vmem [shape: f32[1,64], index: 5, kind: input, shape index: {}]   ;;  %s2386_s7 = inlined_call_operand.vmem [shape: f32[1,16], index: 7, kind: input, shape index: {}]   ;;  %s2387_s8 = inlined_call_operand.vmem [shape: f32[2,128], index: 8, kind: output, shape index: {}]  }
   0x1   :  { %v1685_v0 = vld [vmem:[%s2379_s0 + $0x20] sm:$0xff]  ;;  %v1690_v1 = vld [vmem:[%s2379_s0 + $0x28] sm:$0xff]  ;;  %v1708_v7 = vld [vmem:[%s2379_s0 + $0x10] sm:$0xff]  ;;  %vm131_vm4 = vcmask 1045504   ;;  %s1630_s23 = smov 64   ;;  %vm295_vm5 = vcmask 261120  }
   0x2   :  { %v1695_v2 = vld [vmem:[%s2379_s0] sm:$0xff]  ;;  %v52_v3 = vrot.slane %v1685_v0, 6  ;;  %v53_v4 = vrot.slane %v1690_v1, 6  ;;  %v1702_v5 = vld [vmem:[%s2379_s0 + $0x8] sm:$0xff]  ;;  %v49_v9 = vrot.slane %v1708_v7, 6  ;;  %v1749_v34 = vld [vmem:[%s2379_s0 + $0x18] sm:$0xff] }
   0x3   :  { %v46_v6 = vrot.slane %v1695_v2, 6  ;;  %v47_v8 = vrot.slane %v1702_v5, 6  ;;  %v50_v46 = vrot.slane %v1749_v34, 6  ;;  %v1772_v51 = vld [vmem:[%s2379_s0 + $0x30] sm:$0xff]  ;;  %v1777_v52 = vld [vmem:[%s2379_s0 + $0x38] sm:$0xff]  ;;  %vm221_vm6 = vcmask 1043456  }
   0x4   :  { %v1713_v10 = vsel %vm45_vm0, %v52_v3, %v53_v4  ;;  %v1716_v11 = vsel %vm45_vm0, 0.0, %v52_v3  ;;  %v1722_v13 = vsel %vm45_vm0, %v53_v4, 0.0  ;;  %v55_v61 = vrot.slane %v1772_v51, 6 }
   0x5   :  { %v1719_v12 = vsel %vm45_vm0, 0.0, %v46_v6  ;;  %v261_v14 = vrot.slane %v1716_v11, 5  ;;  %v262_v15 = vrot.slane %v1713_v10, 5  ;;  %v1727_v16 = vsel %vm45_vm0, %v46_v6, %v47_v8 }
   0x6   :  { %v87_v17 = vrot.slane %v1719_v12, 1  ;;  %v88_v18 = vrot.slane %v1727_v16, 1  ;;  %v97_v19 = vrot.slane %v1716_v11, 1  ;;  %v98_v20 = vrot.slane %v1713_v10, 1 }
   0x7   :  { %v177_v21 = vrot.slane %v1719_v12, 3  ;;  %v263_v22 = vsel %vm250_vm1, %v261_v14, %v262_v15  ;;  %v178_v23 = vrot.slane %v1727_v16, 3  ;;  %v187_v24 = vrot.slane %v1716_v11, 3 }
   0x8   :  { %v188_v25 = vrot.slane %v1713_v10, 3  ;;  %279 = vrot.lane.b32.xlu1 %v263_v22, %s1628_s15  ;;  %v89_v26 = vsel %vm86_vm2, %v87_v17, %v88_v18  ;;  %v99_v27 = vsel %vm86_vm2, %v97_v19, %v98_v20  ;;  %v132_v28 = vrot.slane %v1719_v12, 2 }
   0x9   :  { %v133_v29 = vrot.slane %v1727_v16, 2  ;;  %v1488_v30 = vpack.i.bf16 %v89_v26, %v99_v27  ;;  %v179_v31 = vsel %vm176_vm3, %v177_v21, %v178_v23  ;;  %v142_v33 = vrot.slane %v1716_v11, 2 }
   0xa   :  { %v189_v32 = vsel %vm176_vm3, %v187_v24, %v188_v25  ;;  %v143_v37 = vrot.slane %v1713_v10, 2  ;;  %v1754_v38 = vsel %vm45_vm0, %v47_v8, 0.0  ;;  %v100_v40 = vrot.slane %v1722_v13, 1 }
   0xb   :  { %v1498_v35 = vpack.i.bf16 %v179_v31, %v189_v32  ;;  %v134_v36 = vsel %vm131_vm4, %v132_v28, %v133_v29  ;;  %1489 = vrot.lane.b32.xlu0 %v1488_v30, %s1628_s15  ;;  %v90_v39 = vrot.slane %v1754_v38, 1  ;;  %v251_v41 = vrot.slane %v1719_v12, 5 }
   0xc   :  { %v252_v42 = vrot.slane %v1727_v16, 5  ;;  %v144_v43 = vsel %vm131_vm4, %v142_v33, %v143_v37  ;;  %v135_v44 = vrot.slane %v1754_v38, 2  ;;  %v145_v45 = vrot.slane %v1722_v13, 2 }
   0xd   :  { %1499 = vrot.lane.b32.xlu1 %v1498_v35, %s1629_s18  ;;  %v1493_v47 = vpack.i.bf16 %v134_v36, %v144_v43  ;;  %v91_v48 = vsel %vm86_vm2, %v88_v18, %v90_v39  ;;  %v101_v49 = vsel %vm86_vm2, %v98_v20, %v100_v40  ;;  %v264_v50 = vrot.slane %v1722_v13, 5 }
   0xe   :  { %v1503_v53 = vpack.i.bf16 %v91_v48, %v101_v49  ;;  %v136_v54 = vsel %vm131_vm4, %v133_v29, %v135_v44  ;;  %v146_v55 = vsel %vm131_vm4, %v143_v37, %v145_v45  ;;  %v253_v56 = vsel %vm250_vm1, %v251_v41, %v252_v42  ;;  %v1303_v48 = vld [vmem:[%s2380_s1 + $0xc8] sm:$0xff] }
   0xf   :  { %1494 = vrot.lane.b32.xlu0 %v1493_v47, %s1630_s23  ;;  %v254_v57 = vrot.slane %v1754_v38, 5  ;;  %v180_v58 = vrot.slane %v1754_v38, 3  ;;  %v190_v59 = vrot.slane %v1722_v13, 3  ;;  %v1788_v60 = vsel %vm45_vm0, %v49_v9, %v50_v46  ;;  %v1302_v47 = vld [vmem:[%s2380_s1 + $0xc0] sm:$0xff] }
  0x10   :  { %v56_v62 = vrot.slane %v1777_v52, 6  ;;  %v1793_v63 = vsel %vm45_vm0, 0.0, %v49_v9  ;;  %v265_v3 = vsel %vm250_vm1, %v262_v15, %v264_v50  ;;  %v1508_v4 = vpack.i.bf16 %v136_v54, %v146_v55  ;;  %v332_v54 = vld [vmem:[%s2380_s1 + $0x8] sm:$0xff]  ;;  %v1304_v55 = vld [vmem:[%s2380_s1 + $0xd0] sm:$0xff] }
  0x11   :  { %1504 = vrot.lane.b32.xlu1 %v1503_v53, %s1628_s15  ;;  %v255_v6 = vsel %vm250_vm1, %v252_v42, %v254_v57  ;;  %v137_v8 = vrot.slane %v1793_v63, 2  ;;  %v181_v14 = vsel %vm176_vm3, %v178_v23, %v180_v58  ;;  %v1803_v18 = vsel %vm45_vm0, 0.0, %v55_v61  ;;  %v331_v53 = vld [vmem:[%s2380_s1] sm:$0xff] }
  0x12   :  { %v1800_v17 = vsel %vm45_vm0, %v55_v61, %v56_v62  ;;  %v138_v19 = vrot.slane %v1788_v60, 2  ;;  %v191_v9 = vsel %vm176_vm3, %v188_v25, %v190_v59  ;;  %v147_v15 = vrot.slane %v1803_v18, 2 }
  0x13   :  { %271 = vrot.lane.b32.xlu0 %v253_v56, %s1628_s15  ;;  %v148_v20 = vrot.slane %v1800_v17, 2  ;;  %v92_v21 = vrot.slane %v1793_v63, 1  ;;  %v93_v23 = vrot.slane %v1788_v60, 1  ;;  %v102_v24 = vrot.slane %v1803_v18, 1  ;;  %v1305_v56 = vld [vmem:[%s2380_s1 + $0xd8] sm:$0xff] }
  0x14   :  { %v139_v22 = vsel %vm131_vm4, %v137_v8, %v138_v19  ;;  %v103_v26 = vrot.slane %v1800_v17, 1  ;;  %v182_v27 = vrot.slane %v1793_v63, 3  ;;  %v183_v28 = vrot.slane %v1788_v60, 3 }
  0x15   :  { %281 = vrot.lane.b32.xlu1 %v265_v3, %s1628_s15  ;;  %v149_v25 = vsel %vm131_vm4, %v147_v15, %v148_v20  ;;  %v192_v29 = vrot.slane %v1803_v18, 3  ;;  %v193_v30 = vrot.slane %v1800_v17, 3  ;;  %v1513_v31 = vpack.i.bf16 %v181_v14, %v191_v9  ;;  %v333_v3 = vld [vmem:[%s2380_s1 + $0x10] sm:$0xff] }
  0x16   :  { %v1827_v32 = vsel %vm45_vm0, %v50_v46, 0.0  ;;  %v1523_v33 = vpack.i.bf16 %v139_v22, %v149_v25  ;;  %v94_v35 = vsel %vm86_vm2, %v92_v21, %v93_v23  ;;  %v104_v36 = vsel %vm86_vm2, %v102_v24, %v103_v26  ;;  %v1307_v24 = vld [vmem:[%s2380_s1 + $0xe8] sm:$0xff] }
  0x17   :  { %1509 = vrot.lane.b32.xlu0 %v1508_v4, %s1630_s23  ;;  %v1833_v37 = vsel %vm45_vm0, %v56_v62, 0.0  ;;  %v184_v39 = vsel %vm176_vm3, %v182_v27, %v183_v28  ;;  %v194_v40 = vsel %vm176_vm3, %v192_v29, %v193_v30  ;;  %v95_v41 = vrot.slane %v1827_v32, 1  ;;  %v334_v4 = vld [vmem:[%s2380_s1 + $0x18] sm:$0xff]  ;;  %v336_v25 = vld [vmem:[%s2380_s1 + $0x28] sm:$0xff] }
  0x18   :  { %v105_v42 = vrot.slane %v1833_v37, 1  ;;  %v1518_v43 = vpack.i.bf16 %v94_v35, %v104_v36  ;;  %v266_v44 = vrot.slane %v1803_v18, 5  ;;  %v267_v45 = vrot.slane %v1800_v17, 5 }
  0x19   :  { %273 = vrot.lane.b32.xlu1 %v255_v6, %s1628_s15  ;;  %v1528_v46 = vpack.i.bf16 %v184_v39, %v194_v40  ;;  %v96_v49 = vsel %vm86_vm2, %v93_v23, %v95_v41  ;;  %v256_v58 = vrot.slane %v1793_v63, 5  ;;  %v257_v59 = vrot.slane %v1788_v60, 5  ;;  %v1306_v23 = vld [vmem:[%s2380_s1 + $0xe0] sm:$0xff]  ;;  %v1308_v40 = vld [vmem:[%s2380_s1 + $0xf0] sm:$0xff] }
  0x1a   :  { %v106_v50 = vsel %vm86_vm2, %v103_v26, %v105_v42  ;;  %v268_v57 = vsel %vm250_vm1, %v266_v44, %v267_v45  ;;  %v1631_v61 = vmov 0.0|0.0   ;;  %v1426_v62 = vpack.c.bf16 %v1303_v48, %v1302_v47  ;;  %v335_v26 = vld [vmem:[%s2380_s1 + $0x20] sm:$0xff]  ;;  %v337_v41 = vld [vmem:[%s2380_s1 + $0x30] sm:$0xff]  ;;  %v338_v42 = vld [vmem:[%s2380_s1 + $0x38] sm:$0xff] }
  0x1b   :  { %1514 = vrot.lane.b32.xlu0 %v1513_v31, %s1629_s18  ;;  %1425 = vmatprep.subr.bf16.mxu1 %v1631_v61  ;;  %v1533_v6 = vpack.i.bf16 %v96_v49, %v106_v50  ;;  %v140_v8 = vrot.slane %v1827_v32, 2  ;;  %v150_v14 = vrot.slane %v1833_v37, 2  ;;  %v1390_v9 = vpack.c.bf16 %v332_v54, %v331_v53  ;;  %v1310_v47 = vld [vmem:[%s2380_s1 + $0x100] sm:$0xff]  ;;  %v1311_v48 = vld [vmem:[%s2380_s1 + $0x108] sm:$0xff] }
  0x1c   :  { %1389 = vmatprep.subr.bf16.mxu0 %v1631_v61  ;;  %v269_v15 = vrot.slane %v1833_v37, 5  ;;  %1427 = vmatpush1.bf16.msra.mxu1 %v1426_v62  ;;  %v1429_v21 = vpack.c.bf16 %v1305_v56, %v1304_v55  ;;  %v1393_v22 = vpack.c.bf16 %v334_v4, %v333_v3  ;;  %v258_v27 = vsel %vm250_vm1, %v256_v58, %v257_v59  ;;  %v339_v49 = vld [vmem:[%s2380_s1 + $0x40] sm:$0xff]  ;;  %v340_v50 = vld [vmem:[%s2380_s1 + $0x48] sm:$0xff]  ;;  %v1313_v58 = vld [vmem:[%s2380_s1 + $0x118] sm:$0xff] }
  0x1d   :  { %1524 = vrot.lane.b32.xlu1 %v1523_v33, %s1630_s23  ;;  %1391 = vmatpush1.bf16.msra.mxu0 %v1390_v9  ;;  %v141_v29 = vsel %vm131_vm4, %v138_v19, %v140_v8  ;;  %v151_v31 = vsel %vm131_vm4, %v148_v20, %v150_v14  ;;  %v259_v35 = vrot.slane %v1827_v32, 5  ;;  %v1432_v36 = vpack.c.bf16 %v1307_v24, %v1306_v23  ;;  %v1309_v19 = vld [vmem:[%s2380_s1 + $0xf8] sm:$0xff]  ;;  %v1315_v8 = vld [vmem:[%s2380_s1 + $0x128] sm:$0xff]  ;;  %v345_v23 = vld [vmem:[%s2380_s1 + $0x70] sm:$0xff] }
  0x1e   :  { %1428 = vmatprep.subr.bf16.mxu1 %v1631_v61  ;;  %1392 = vmatprep.subr.bf16.mxu0 %v1631_v61  ;;  %v270_v33 = vsel %vm250_vm1, %v267_v45, %v269_v15  ;;  %v1396_v39 = vpack.c.bf16 %v336_v25, %v335_v26  ;;  %v1538_v20 = vpack.i.bf16 %v141_v29, %v151_v31  ;;  %v185_v54 = vrot.slane %v1827_v32, 3  ;;  %v344_v14 = vld [vmem:[%s2380_s1 + $0x68] sm:$0xff]  ;;  %v346_v24 = vld [vmem:[%s2380_s1 + $0x78] sm:$0xff]  ;;  %v347_v31 = vld [vmem:[%s2380_s1 + $0x80] sm:$0xff] }
  0x1f   :  { %1519 = vrot.lane.b32.xlu0 %v1518_v43, %s1628_s15  ;;  %v195_v43 = vrot.slane %v1833_v37, 3  ;;  %v260_v44 = vsel %vm250_vm1, %v257_v59, %v259_v35  ;;  %v1435_v45 = vpack.c.bf16 %v1309_v19, %v1308_v40  ;;  %v1438_v55 = vpack.c.bf16 %v1311_v48, %v1310_v47  ;;  %v342_v59 = vld [vmem:[%s2380_s1 + $0x58] sm:$0xff]  ;;  %v1319_v29 = vld [vmem:[%s2380_s1 + $0x148] sm:$0xff]  ;;  %v349_v19 = vld [vmem:[%s2380_s1 + $0x90] sm:$0xff] }
  0x20   :  { %1430 = vmatpush1.bf16.msra.mxu1 %v1429_v21  ;;  %v1402_v56 = vpack.c.bf16 %v340_v50, %v339_v49  ;;  %v186_v62 = vsel %vm176_vm3, %v183_v28, %v185_v54  ;;  %v343_v28 = vld [vmem:[%s2380_s1 + $0x60] sm:$0xff]  ;;  %v1316_v21 = vld [vmem:[%s2380_s1 + $0x130] sm:$0xff]  ;;  %v1411_v25 = vpack.c.bf16 %v346_v24, %v345_v23  ;;  %v1321_v40 = vld [vmem:[%s2380_s1 + $0x158] sm:$0xff]  ;;  %v233_v23 = vrot.slane %v1713_v10, 4 }
  0x21   :  { %1529 = vrot.lane.b32.xlu1 %v1528_v46, %s1629_s18  ;;  %1394 = vmatpush1.bf16.msra.mxu0 %v1393_v22  ;;  %v1399_v46 = vpack.c.bf16 %v338_v42, %v337_v41  ;;  %v196_v53 = vsel %vm176_vm3, %v193_v30, %v195_v43  ;;  %v341_v30 = vld [vmem:[%s2380_s1 + $0x50] sm:$0xff]  ;;  %v1408_v15 = vpack.c.bf16 %v344_v14, %v343_v28  ;;  %v1317_v22 = vld [vmem:[%s2380_s1 + $0x138] sm:$0xff]  ;;  %v1322_v43 = vld [vmem:[%s2380_s1 + $0x160] sm:$0xff]  ;;  %vm304_vm7 = vcmask 523264  }
  0x22   :  { %1431 = vmatprep.subr.bf16.mxu1 %v1631_v61  ;;  %1395 = vmatprep.subr.bf16.mxu0 %v1631_v61  ;;  %v1405_v4 = vpack.c.bf16 %v342_v59, %v341_v30  ;;  %v1447_v26 = vpack.c.bf16 %v1317_v22, %v1316_v21  ;;  %v1334_v48 = vld [vmem:[%s2381_s3 + $0x10] sm:$0xff]  ;;  %vm313_vm8 = vcmask 785408   ;;  %vm647_vm9 = vcmask 269512  }
  0x23   :  { %283 = vrot.lane.b32.xlu0 %v268_v57, %s1628_s15  ;;  %v1312_v57 = vld [vmem:[%s2380_s1 + $0x110] sm:$0xff]  ;;  %vm622_vm10 = vcmask 203912   ;;  %vm672_vm11 = vcmask 335112   ;;  %vm693_vm15 = vcmask 1041409   ;;  %vm518_vm1 = vcmask 138248  }
  0x24   :  { %1433 = vmatpush1.bf16.msra.mxu1 %v1432_v36  ;;  %v1441_v3 = vpack.c.bf16 %v1313_v58, %v1312_v57  ;;  %v1324_v50 = vld [vmem:[%s2380_s1 + $0x170] sm:$0xff]  ;;  %v932_v57 = vmul.f32 %v1334_v48, %v1685_v0  ;;  %v538_v0 = vld [vmem:[%s2381_s3 + $0x8] sm:$0xff]  ;;  %vm1636_vm2 = vmmov 0   ;;  %vm716_vm3 = vcmask 130048  }
  0x25   :  { %1534 = vrot.lane.b32.xlu1 %v1533_v6, %s1628_s15  ;;  %1397 = vmatpush1.bf16.msra.mxu0 %v1396_v39  ;;  %v1314_v6 = vld [vmem:[%s2380_s1 + $0x120] sm:$0xff]  ;;  %v1320_v39 = vld [vmem:[%s2380_s1 + $0x150] sm:$0xff]  ;;  %vm718_vm4 = vcmask 195584  }
  0x26   :  { %1434 = vmatprep.subr.bf16.mxu1 %v1631_v61  ;;  %1398 = vmatprep.subr.bf16.mxu0 %v1631_v61  ;;  %v1444_v9 = vpack.c.bf16 %v1315_v8, %v1314_v6  ;;  %v1453_v41 = vpack.c.bf16 %v1321_v40, %v1320_v39  ;;  %v353_v54 = vld [vmem:[%s2380_s1 + $0xb0] sm:$0xff]  ;;  %v934_v6 = vmul.f32 %v1334_v48, %v1772_v51 }
  0x27   :  { %275 = vrot.lane.b32.xlu0 %v258_v27, %s1628_s15  ;;  %v1318_v27 = vld [vmem:[%s2380_s1 + $0x140] sm:$0xff]  ;;  %v540_v8 = vmul.f32 %v538_v0, %v1702_v5  ;;  %v542_v51 = vmul.f32 %v538_v0, %v1749_v34 }
  0x28   :  { %1436 = vmatpush1.bf16.msra.mxu1 %v1435_v45  ;;  %v1450_v35 = vpack.c.bf16 %v1319_v29, %v1318_v27  ;;  %v351_v45 = vld [vmem:[%s2380_s1 + $0xa0] sm:$0xff]  ;;  %v942_v28 = vsel %vm295_vm5, %v934_v6, 0.0 }
  0x29   :  { %285 = vrot.lane.b32.xlu1 %v270_v33, %s1628_s15  ;;  %1400 = vmatpush1.bf16.msra.mxu0 %v1399_v46  ;;  %v348_v33 = vld [vmem:[%s2380_s1 + $0x88] sm:$0xff]  ;;  %v552_v22 = vsel %vm295_vm5, %v542_v51, 0.0 }
  0x2a   :  { %1437 = vmatprep.subr.bf16.mxu1 %v1631_v61  ;;  %1401 = vmatprep.subr.bf16.mxu0 %v1631_v61  ;;  %v1414_v36 = vpack.c.bf16 %v348_v33, %v347_v31  ;;  %v352_v46 = vld [vmem:[%s2380_s1 + $0xa8] sm:$0xff]  ;;  %v222_v31 = vrot.slane %v1719_v12, 4  ;;  %v223_v33 = vrot.slane %v1727_v16, 4 }
  0x2b   :  { %1539 = vrot.lane.b32.xlu0 %v1538_v20, %s1630_s23  ;;  %v350_v20 = vld [vmem:[%s2380_s1 + $0x98] sm:$0xff]  ;;  %v1420_v49 = vpack.c.bf16 %v352_v46, %v351_v45 }
  0x2c   :  { %1439 = vmatpush1.bf16.msra.mxu1 %v1438_v55  ;;  %v1417_v42 = vpack.c.bf16 %v350_v20, %v349_v19  ;;  %v354_v55 = vld [vmem:[%s2380_s1 + $0xb8] sm:$0xff] }
  0x2d   :  { %277 = vrot.lane.b32.xlu1 %v260_v44, %s1628_s15  ;;  %1403 = vmatpush1.bf16.msra.mxu0 %v1402_v56  ;;  %v1323_v44 = vld [vmem:[%s2380_s1 + $0x168] sm:$0xff]  ;;  %v1335_v56 = vld [vmem:[%s2381_s3 + $0x18] sm:$0xff]  ;;  %v1423_v30 = vpack.c.bf16 %v354_v55, %v353_v54 }
  0x2e   :  { %1440 = vmatprep.subr.bf16.mxu1 %v1631_v61  ;;  %1404 = vmatprep.subr.bf16.mxu0 %v1631_v61  ;;  %v1456_v47 = vpack.c.bf16 %v1323_v44, %v1322_v43  ;;  %v933_v59 = vmul.f32 %v1335_v56, %v1690_v1  ;;  %v537_v1 = vld [vmem:[%s2381_s3] sm:$0xff]  ;;  %v224_v43 = vsel %vm221_vm6, %v222_v31, %v223_v33 }
  0x2f   :  { %211 = vrot.lane.b32.xlu0 %v196_v53, %s1629_s18  ;;  %v1325_v53 = vld [vmem:[%s2380_s1 + $0x178] sm:$0xff]  ;;  %v539_v14 = vmul.f32 %v537_v1, %v1695_v2  ;;  %v541_v21 = vmul.f32 %v537_v1, %v1708_v7  ;;  %v232_v2 = vrot.slane %v1716_v11, 4 }
  0x30   :  { %1442 = vmatpush1.bf16.msra.mxu1 %v1441_v3  ;;  %v1459_v58 = vpack.c.bf16 %v1325_v53, %v1324_v50  ;;  %v935_v3 = vmul.f32 %v1335_v56, %v1777_v52 }
  0x31   :  { %1406 = vmatpush1.bf16.msra.mxu0 %v1405_v4  ;;  %1443 = vmatprep.subr.bf16.mxu1 %v1631_v61  ;;  %v939_v4 = vsel %vm295_vm5, %v933_v59, 0.0  ;;  %v549_v5 = vsel %vm295_vm5, %v541_v21, 0.0  ;;  %v234_v34 = vsel %vm221_vm6, %v232_v2, %v233_v23 }
  0x32   :  { %1407 = vmatprep.subr.bf16.mxu0 %v1631_v61  ;;  %v945_v52 = vsel %vm295_vm5, %v935_v3, 0.0 }
  0x33   :  { %203 = vrot.lane.b32.xlu0 %v186_v62, %s1629_s18  ;;  %v936_v62 = vsel %vm295_vm5, %v932_v57, 0.0 }
  0x34   :  { %1445 = vmatpush1.bf16.msra.mxu1 %v1444_v9  ;;  %v546_v9 = vsel %vm295_vm5, %v540_v8, 0.0 }
  0x35   :  { %1409 = vmatpush1.bf16.msra.mxu0 %v1408_v15  ;;  %1446 = vmatprep.subr.bf16.mxu1 %v1631_v61  ;;  %v543_v15 = vsel %vm295_vm5, %v539_v14, 0.0  ;;  %v237_v14 = vrot.slane %v1803_v18, 4 }
  0x36   :  { %1410 = vmatprep.subr.bf16.mxu0 %v1631_v61 }
  0x38   :  { %1448 = vmatpush1.bf16.msra.mxu1 %v1447_v26 }
  0x39   :  { %1412 = vmatpush1.bf16.msra.mxu0 %v1411_v25  ;;  %1449 = vmatprep.subr.bf16.mxu1 %v1631_v61 }
  0x3a   :  { %1413 = vmatprep.subr.bf16.mxu0 %v1631_v61 }
  0x3c   :  { %1451 = vmatpush1.bf16.msra.mxu1 %v1450_v35  ;;  %v235_v35 = vrot.slane %v1722_v13, 4 }
  0x3d   :  { %1415 = vmatpush1.bf16.msra.mxu0 %v1414_v36  ;;  %1452 = vmatprep.subr.bf16.mxu1 %v1631_v61 }
  0x3e   :  { %1416 = vmatprep.subr.bf16.mxu0 %v1631_v61  ;;  %v236_v46 = vsel %vm221_vm6, %v233_v23, %v235_v35 }
  0x40   :  { %1454 = vmatpush1.bf16.msra.mxu1 %v1453_v41 }
  0x41   :  { %1418 = vmatpush1.bf16.msra.mxu0 %v1417_v42  ;;  %1455 = vmatprep.subr.bf16.mxu1 %v1631_v61 }
  0x42   :  { %1419 = vmatprep.subr.bf16.mxu0 %v1631_v61 }
  0x44   :  { %1457 = vmatpush1.bf16.msra.mxu1 %v1456_v47  ;;  %v225_v47 = vrot.slane %v1754_v38, 4 }
  0x45   :  { %1421 = vmatpush1.bf16.msra.mxu0 %v1420_v49  ;;  %1458 = vmatprep.subr.bf16.mxu1 %v1631_v61 }
  0x46   :  { %1422 = vmatprep.subr.bf16.mxu0 %v1631_v61  ;;  %v226_v56 = vsel %vm221_vm6, %v223_v33, %v225_v47 }
  0x48   :  { %1460 = vmatpush1.bf16.msra.mxu1 %v1459_v58 }
  0x49   :  { %1424 = vmatpush1.bf16.msra.mxu0 %v1423_v30  ;;  %1467 = vmatprep.subr.bf16.mxu1 %v1631_v61 }
  0x4a   :  { %1461 = vmatprep.subr.bf16.mxu0 %v1631_v61 }
  0x51   :  { %937 = vadd.xlane.f32.xlu1 %v936_v62  ;;  %v1632_v62 = vmov 41  }
  0x52   :  { %940 = vadd.xlane.f32.xlu0 %v939_v4  ;;  %1544 = vset.pattern.permute.xlu1 %v1632_v62 }
  0x53   :  { %1543 = vset.pattern.permute.xlu0 %v1632_v62 }
  0x55   :  { %946 = vadd.xlane.f32.xlu1 %v945_v52 }
  0x56   :  { %943 = vadd.xlane.f32.xlu0 %v942_v28 }
  0x59   :  { %547 = vadd.xlane.f32.xlu1 %v546_v9  ;;  %v238_v9 = vrot.slane %v1800_v17, 4 }
  0x5a   :  { %544 = vadd.xlane.f32.xlu0 %v543_v15 }
  0x5b   :  { %v239_v23 = vsel %vm221_vm6, %v237_v14, %v238_v9 }
  0x5d   :  { %553 = vadd.xlane.f32.xlu1 %v552_v22 }
  0x5e   :  { %550 = vadd.xlane.f32.xlu0 %v549_v5 }
  0x7a   :  { %v280_v24 = vpop.permute.xlu1 %279 }
  0x7b   :  { %v326_v26 = vsel %vm295_vm5, %v234_v34, %v280_v24  ;;  %v227_v34 = vrot.slane %v1793_v63, 4  ;;  %v228_v24 = vrot.slane %v1788_v60, 4 }
  0x7c   :  { %1326 = vmatprep.mubr.msk.f32.mxu1 %vm304_vm7, %v326_v26 }
  0x7d   :  { %v1490_v7 = vpop.permute.xlu0 %1489 }
  0x7e   :  { %v1492_v27 = vunpack.i.h.bf16 %v1490_v7  ;;  %v1491_v29 = vunpack.i.l.bf16 %v1490_v7 }
  0x7f   :  { %v1500_v25 = vpop.permute.xlu1 %1499 }
  0x80   :  { %v1501_v36 = vunpack.i.l.bf16 %v1500_v25  ;;  %v1502_v41 = vunpack.i.h.bf16 %v1500_v25  ;;  %v300_v42 = vsel %vm295_vm5, %v1716_v11, %v1491_v29  ;;  %v296_v44 = vsel %vm295_vm5, %v1719_v12, %v1492_v27 }
  0x81   :  { %v1495_v39 = vpop.permute.xlu0 %1494  ;;  %v240_v25 = vrot.slane %v1833_v37, 4 }
  0x82   :  { %v1497_v40 = vunpack.i.h.bf16 %v1495_v39  ;;  %v1496_v19 = vunpack.i.l.bf16 %v1495_v39 }
  0x83   :  { %v1505_v20 = vpop.permute.xlu1 %1504  ;;  %v241_v37 = vsel %vm221_vm6, %v238_v9, %v240_v25 }
  0x84   :  { %v309_v45 = vsel %vm304_vm7, %v300_v42, %v1496_v19  ;;  %v305_v13 = vsel %vm304_vm7, %v296_v44, %v1497_v40  ;;  %v1507_v54 = vunpack.i.h.bf16 %v1505_v20  ;;  %v1506_v55 = vunpack.i.l.bf16 %v1505_v20 }
  0x85   :  { %v272_v48 = vpop.permute.xlu0 %271  ;;  %v318_v49 = vsel %vm313_vm8, %v309_v45, %v1501_v36  ;;  %v314_v12 = vsel %vm313_vm8, %v305_v13, %v1502_v41  ;;  %v229_v40 = vsel %vm221_vm6, %v227_v34, %v228_v24  ;;  %v230_v19 = vrot.slane %v1827_v32, 4 }
  0x86   :  { %825 = vmatmul.mubr.f32.vlgmr.msra.gmra.mrb[0].mxu1 %v318_v49  ;;  %v322_v11 = vsel %vm295_vm5, %v224_v43, %v272_v48  ;;  %v297_v3 = vsel %vm295_vm5, %v1727_v16, %v1507_v54  ;;  %v301_v0 = vsel %vm295_vm5, %v1713_v10, %v1506_v55 }
  0x87   :  { %v282_v50 = vpop.permute.xlu1 %281  ;;  %1291 = vmatprep.mubr.msk.f32.mxu0 %vm304_vm7, %v322_v11  ;;  %v231_v45 = vsel %vm221_vm6, %v228_v24, %v230_v19  ;;  %vm1115_vm6 = vcmask 326656  }
  0x88   :  { %v327_v53 = vsel %vm295_vm5, %v236_v46, %v282_v50  ;;  %432 = vmatmul.mubr.f32.vlgmr.msra.gmra.mrb[0].mxu0 %v314_v12 }
  0x89   :  { %1327 = vmatprep.mubr.msk.f32.mxu1 %vm304_vm7, %v327_v53  ;;  %v1510_v38 = vpop.permute.xlu0 %1509 }
  0x8a   :  { %v1512_v58 = vunpack.i.h.bf16 %v1510_v38  ;;  %v1511_v30 = vunpack.i.l.bf16 %v1510_v38 }
  0x8b   :  { %v274_v57 = vpop.permute.xlu1 %273 }
  0x8c   :  { %v323_v59 = vsel %vm295_vm5, %v226_v56, %v274_v57  ;;  %v306_v8 = vsel %vm304_vm7, %v297_v3, %v1512_v58  ;;  %v310_v28 = vsel %vm304_vm7, %v301_v0, %v1511_v30 }
  0x8d   :  { %1292 = vmatprep.mubr.msk.f32.mxu0 %vm304_vm7, %v323_v59  ;;  %v1515_v4 = vpop.permute.xlu0 %1514 }
  0x8e   :  { %v1517_v6 = vunpack.i.h.bf16 %v1515_v4  ;;  %v1516_v1 = vunpack.i.l.bf16 %v1515_v4 }
  0x8f   :  { %v1525_v52 = vpop.permute.xlu1 %1524 }
  0x90   :  { %v315_v51 = vsel %vm313_vm8, %v306_v8, %v1517_v6  ;;  %v319_v15 = vsel %vm313_vm8, %v310_v28, %v1516_v1  ;;  %v1526_v16 = vunpack.i.l.bf16 %v1525_v52  ;;  %v1527_v26 = vunpack.i.h.bf16 %v1525_v52 }
  0x91   :  { %v1520_v21 = vpop.permute.xlu0 %1519  ;;  %437 = vmatmul.mubr.f32.gmra.mrb[2].mxu0 %v315_v51  ;;  %830 = vmatmul.mubr.f32.gmra.mrb[2].mxu1 %v319_v15 }
  0x92   :  { %v1522_v10 = vunpack.i.h.bf16 %v1520_v21  ;;  %v1521_v22 = vunpack.i.l.bf16 %v1520_v21  ;;  %v1301_v21 = vld [vmem:[%s2382_s2 + $0x1] sm:$0x1] }
  0x93   :  { %v1530_v5 = vpop.permute.xlu1 %1529 }
  0x94   :  { %v1531_v2 = vunpack.i.l.bf16 %v1530_v5  ;;  %v302_v7 = vsel %vm295_vm5, %v1803_v18, %v1521_v22  ;;  %v298_v31 = vsel %vm295_vm5, %v1793_v63, %v1522_v10  ;;  %v1532_v39 = vunpack.i.h.bf16 %v1530_v5 }
  0x95   :  { %v284_v27 = vpop.permute.xlu0 %283  ;;  %v311_v29 = vsel %vm304_vm7, %v302_v7, %v1526_v16  ;;  %v307_v18 = vsel %vm304_vm7, %v298_v31, %v1527_v26 }
  0x96   :  { %v328_v33 = vsel %vm295_vm5, %v239_v23, %v284_v27  ;;  %v320_v35 = vsel %vm313_vm8, %v311_v29, %v1531_v2  ;;  %v316_v43 = vsel %vm313_vm8, %v307_v18, %v1532_v39  ;;  %v330_v39 = vld [vmem:[%s2382_s2] sm:$0x1]  ;;  %s1634_s2 = smov 127  }
  0x97   :  { %v1535_v36 = vpop.permute.xlu1 %1534  ;;  %1328 = vmatprep.mubr.msk.f32.mxu1 %vm304_vm7, %v328_v33 }
  0x98   :  { %835 = vmatmul.mubr.f32.gmra.mrb[4].mxu1 %v320_v35  ;;  %v1536_v41 = vunpack.i.l.bf16 %v1535_v36  ;;  %v1537_v13 = vunpack.i.h.bf16 %v1535_v36 }
  0x99   :  { %v276_v20 = vpop.permute.xlu0 %275 }
  0x9a   :  { %v324_v63 = vsel %vm295_vm5, %v229_v40, %v276_v20  ;;  %v303_v32 = vsel %vm295_vm5, %v1800_v17, %v1536_v41  ;;  %v299_v54 = vsel %vm295_vm5, %v1788_v60, %v1537_v13 }
  0x9b   :  { %v286_v42 = vpop.permute.xlu1 %285  ;;  %1293 = vmatprep.mubr.msk.f32.mxu0 %vm304_vm7, %v324_v63 }
  0x9c   :  { %v329_v44 = vsel %vm295_vm5, %v241_v37, %v286_v42  ;;  %442 = vmatmul.mubr.f32.gmra.mrb[4].mxu0 %v316_v43 }
  0x9d   :  { %1329 = vmatprep.mubr.msk.f32.mxu1 %vm304_vm7, %v329_v44  ;;  %v1540_v46 = vpop.permute.xlu0 %1539 }
  0x9e   :  { %v1541_v47 = vunpack.i.l.bf16 %v1540_v46  ;;  %v1542_v11 = vunpack.i.h.bf16 %v1540_v46  ;;  %v453_v46 = vlaneseq }
  0x9f   :  { %v278_v48 = vpop.permute.xlu1 %277 }
  0xa0   :  { %v325_v49 = vsel %vm295_vm5, %v231_v45, %v278_v48  ;;  %v312_v50 = vsel %vm304_vm7, %v303_v32, %v1541_v47  ;;  %v308_v17 = vsel %vm304_vm7, %v299_v54, %v1542_v11  ;;  %v2157_v47 = vshrl.u32 %v453_v46, 7 }
  0xa1   :  { %1294 = vmatprep.mubr.msk.f32.mxu0 %vm304_vm7, %v325_v49  ;;  %v212_v53 = vpop.permute.xlu0 %211 }
  0xa2   :  { %v321_v12 = vsel %vm313_vm8, %v312_v50, %v212_v53  ;;  %v455_v50 = vsub.s32 0, %v2157_v47 }
  0xa3   :  { %840 = vmatmul.mubr.f32.gmra.mrb[6].mxu1 %v321_v12 }
  0xa5   :  { %v204_v55 = vpop.permute.xlu0 %203 }
  0xa6   :  { %v317_v56 = vsel %vm313_vm8, %v308_v17, %v204_v55 }
  0xa7   :  { %447 = vmatmul.mubr.f32.gmra.mrb[6].mxu0 %v317_v56  ;;  %v1633_v56 = vmov 0  }
  0xde   :  { %v938_v38 = vpop.xlane.xlu1 %937 }
  0xdf   :  { %v941_v57 = vpop.xlane.xlu0 %940 }
  0xe0   :  { %v948_v58 = vadd.f32 %v941_v57, %v938_v38 }
  0xe2   :  { %v947_v30 = vpop.xlane.xlu1 %946  ;;  %v949_v59 = vrot.slane %v948_v58, 4 }
  0xe3   :  { %v944_v3 = vpop.xlane.xlu0 %943 }
  0xe4   :  { %v950_v0 = vadd.f32 %v949_v59, %v948_v58  ;;  %v955_v4 = vadd.f32 %v947_v30, %v944_v3  ;;  %v2160_v59 = vrot.slane %v1301_v21, %v455_v50  ;;  %v2162_v3 = vrot.slane %v330_v39, %v455_v50 }
  0xe6   :  { %v548_v6 = vpop.xlane.xlu1 %547  ;;  %v951_v1 = vrot.slane %v950_v0, 2  ;;  %v956_v52 = vrot.slane %v955_v4, 4 }
  0xe7   :  { %v545_v8 = vpop.xlane.xlu0 %544 }
  0xe8   :  { %v952_v60 = vadd.f32 %v951_v1, %v950_v0  ;;  %v957_v28 = vadd.f32 %v956_v52, %v955_v4  ;;  %v555_v14 = vadd.f32 %v548_v6, %v545_v8 }
  0xea   :  { %v554_v9 = vpop.xlane.xlu1 %553  ;;  %v953_v51 = vrot.slane %v952_v60, 1  ;;  %v958_v15 = vrot.slane %v957_v28, 2  ;;  %v556_v16 = vrot.slane %v555_v14, 4 }
  0xeb   :  { %v551_v10 = vpop.xlane.xlu0 %550 }
  0xec   :  { %v954_v22 = vadd.f32 %v953_v51, %v952_v60  ;;  %v959_v5 = vadd.f32 %v958_v15, %v957_v28  ;;  %v557_v2 = vadd.f32 %v556_v16, %v555_v14  ;;  %v562_v23 = vadd.f32 %v554_v9, %v551_v10 }
  0xee   :  { %v962_v34 = vadd.f32 %v1301_v21, %v954_v22  ;;  %v960_v24 = vrot.slane %v959_v5, 1  ;;  %v558_v26 = vrot.slane %v557_v2, 2  ;;  %v563_v7 = vrot.slane %v562_v23, 4 }
  0xf0   :  { %v1336_v25 = vmul.f32 -1.442695, %v962_v34  ;;  %v961_v27 = vadd.f32 %v960_v24, %v959_v5  ;;  %v559_v29 = vadd.f32 %v558_v26, %v557_v2  ;;  %v564_v31 = vadd.f32 %v563_v7, %v562_v23 }
  0xf2   :  { %1548 = vpow2.f32 %v1336_v25  ;;  %v963_v33 = vadd.f32 %v1301_v21, %v961_v27  ;;  %v560_v35 = vrot.slane %v559_v29, 1  ;;  %v565_v36 = vrot.slane %v564_v31, 2 }
  0xf4   :  { %v1337_v40 = vmul.f32 -1.442695, %v963_v33  ;;  %v561_v18 = vadd.f32 %v560_v35, %v559_v29  ;;  %v566_v37 = vadd.f32 %v565_v36, %v564_v31 }
  0xf6   :  { %1550 = vpow2.f32 %v1337_v40  ;;  %v569_v19 = vadd.f32 %v561_v18, %v330_v39  ;;  %v567_v20 = vrot.slane %v566_v37, 1 }
  0xf8   :  { %v1299_v41 = vmul.f32 -1.442695, %v569_v19  ;;  %v568_v63 = vadd.f32 %v567_v20, %v566_v37 }
  0xfa   :  { %1552 = vpow2.f32 %v1299_v41  ;;  %v570_v42 = vadd.f32 %v568_v63, %v330_v39 }
  0xfc   :  { %v1549_v43 = vpop.eup %1548  ;;  %v1300_v44 = vmul.f32 -1.442695, %v570_v42 }
  0xfd   :  { %v970_v45 = vadd.f32 1.0, %v1549_v43 }
  0xfe   :  { %1554 = vpow2.f32 %v1300_v44 }
  0xff   :  { %1556 = vrcp.f32 %v970_v45 }
 0x100   :  { %v1551_v32 = vpop.eup %1550 }
 0x101   :  { %v971_v13 = vadd.f32 1.0, %v1551_v32 }
 0x103   :  { %1558 = vrcp.f32 %v971_v13 }
 0x104   :  { %v1553_v48 = vpop.eup %1552 }
 0x105   :  { %v577_v49 = vadd.f32 1.0, %v1553_v48 }
 0x107   :  { %1560 = vrcp.f32 %v577_v49 }
 0x108   :  { %v1555_v11 = vpop.eup %1554 }
 0x109   :  { %v1557_v53 = vpop.eup %1556  ;;  %v578_v12 = vadd.f32 1.0, %v1555_v11 }
 0x10a   :  { %v981_v54 = vrot.slane %v1557_v53, %v455_v50 }
 0x10b   :  { %1562 = vrcp.f32 %v578_v12 }
 0x10c   :  { %987 = vperm.xlu0 %1543, %v981_v54  }
 0x10d   :  { %v1559_v55 = vpop.eup %1558 }
 0x10e   :  { %v985_v17 = vrot.slane %v1559_v55, %v455_v50 }
 0x110   :  { %991 = vperm.xlu1 %1544, %v985_v17   ;;  %1546 = vset.pattern.permute.xlu0 %v1633_v56 }
 0x111   :  { %v1561_v38 = vpop.eup %1560 }
 0x112   :  { %v591_v57 = vrot.slane %v1561_v38, %v455_v50 }
 0x114   :  { %597 = vperm.xlu1 %1544, %v591_v57  }
 0x115   :  { %v1563_v58 = vpop.eup %1562 }
 0x116   :  { %v595_v30 = vrot.slane %v1563_v58, %v455_v50 }
 0x118   :  { %601 = vperm.xlu1 %1544, %v595_v30  }
 0x11c   :  { %1545 = vset.pattern.permute.xlu1 %v1633_v56 }
 0x159   :  { %v2164_v0 = vpop.f32.mrb[0].mxu1 }
 0x15a   :  { %v851_v4 = vadd.f32 %v2160_v59, %v2164_v0  ;;  %v828_v6 = vpop.f32.mrb[1].mxu1 }
 0x15b   :  { %v2168_v1 = vpop.f32.mrb[0].mxu0 }
 0x15c   :  { %v1330_v52 = vmul.f32 -1.442695, %v851_v4  ;;  %v458_v8 = vadd.f32 %v2162_v3, %v2168_v1  ;;  %v435_v60 = vpop.f32.mrb[1].mxu0 }
 0x15e   :  { %1564 = vpow2.f32 %v1330_v52  ;;  %v1295_v28 = vmul.f32 -1.442695, %v458_v8 }
 0x160   :  { %1566 = vpow2.f32 %v1295_v28 }
 0x164   :  { %v2172_v14 = vpop.f32.mrb[2].mxu0  ;;  %v2174_v9 = vpop.f32.mrb[2].mxu1 }
 0x165   :  { %v459_v51 = vadd.f32 %v2162_v3, %v2172_v14  ;;  %v852_v15 = vadd.f32 %v2160_v59, %v2174_v9  ;;  %v440_v16 = vpop.f32.mrb[3].mxu0  ;;  %v833_v21 = vpop.f32.mrb[3].mxu1 }
 0x166   :  { %v2208_v16 = vadd.s32 8, %v2157_v47 }
 0x167   :  { %v1296_v10 = vmul.f32 -1.442695, %v459_v51  ;;  %v1331_v22 = vmul.f32 -1.442695, %v852_v15 }
 0x168   :  { %v1565_v5 = vpop.eup %1564  ;;  %vm642_vm12 = vcmp.lt.s32.totalorder %v2208_v16, 14  ;;  %vm617_vm13 = vcmp.lt.s32.totalorder %v2208_v16, 15  ;;  %vm667_vm14 = vcmp.lt.s32.totalorder %v2208_v16, 13 }
 0x169   :  { %v867_v2 = vadd.f32 1.0, %v1565_v5  ;;  %1568 = vpow2.f32 %v1296_v10 }
 0x16a   :  { %v1567_v23 = vpop.eup %1566  ;;  %1570 = vpow2.f32 %v1331_v22 }
 0x16b   :  { %1572 = vrcp.f32 %v867_v2  ;;  %v474_v34 = vadd.f32 1.0, %v1567_v23  ;;  %v2180_v24 = vpop.f32.mrb[4].mxu1 }
 0x16c   :  { %v853_v26 = vadd.f32 %v2160_v59, %v2180_v24  ;;  %v838_v7 = vpop.f32.mrb[5].mxu1 }
 0x16d   :  { %1574 = vrcp.f32 %v474_v34 }
 0x16e   :  { %v1332_v25 = vmul.f32 -1.442695, %v853_v26 }
 0x16f   :  { %v2184_v27 = vpop.f32.mrb[4].mxu0 }
 0x170   :  { %1576 = vpow2.f32 %v1332_v25  ;;  %v460_v29 = vadd.f32 %v2162_v3, %v2184_v27  ;;  %v445_v31 = vpop.f32.mrb[5].mxu0 }
 0x172   :  { %v1297_v33 = vmul.f32 -1.442695, %v460_v29 }
 0x173   :  { %v1569_v35 = vpop.eup %1568 }
 0x174   :  { %v1571_v36 = vpop.eup %1570  ;;  %v475_v39 = vadd.f32 1.0, %v1569_v35  ;;  %1578 = vpow2.f32 %v1297_v33 }
 0x175   :  { %v1573_v40 = vpop.eup %1572  ;;  %v868_v18 = vadd.f32 1.0, %v1571_v36 }
 0x176   :  { %1580 = vrcp.f32 %v475_v39  ;;  %881 = vperm.xlu1 %1545, %v1573_v40   ;;  %v2188_v37 = vpop.f32.mrb[6].mxu1 }
 0x177   :  { %1582 = vrcp.f32 %v868_v18  ;;  %v854_v19 = vadd.f32 %v2160_v59, %v2188_v37  ;;  %v843_v20 = vpop.f32.mrb[7].mxu1  ;;  %v1575_v41 = vpop.eup %1574 }
 0x179   :  { %v1333_v63 = vmul.f32 -1.442695, %v854_v19 }
 0x17a   :  { %v1577_v42 = vpop.eup %1576  ;;  %v2192_v43 = vpop.f32.mrb[6].mxu0  ;;  %488 = vperm.xlu1 %1545, %v1575_v41  }
 0x17b   :  { %v869_v44 = vadd.f32 1.0, %v1577_v42  ;;  %1584 = vpow2.f32 %v1333_v63  ;;  %v461_v45 = vadd.f32 %v2162_v3, %v2192_v43  ;;  %v450_v46 = vpop.f32.mrb[7].mxu0 }
 0x17d   :  { %1586 = vrcp.f32 %v869_v44  ;;  %v1298_v32 = vmul.f32 -1.442695, %v461_v45 }
 0x17e   :  { %v1579_v13 = vpop.eup %1578 }
 0x17f   :  { %v476_v48 = vadd.f32 1.0, %v1579_v13  ;;  %1588 = vpow2.f32 %v1298_v32 }
 0x180   :  { %v1581_v49 = vpop.eup %1580 }
 0x181   :  { %v1583_v50 = vpop.eup %1582  ;;  %1590 = vrcp.f32 %v476_v48  ;;  %493 = vperm.xlu0 %1546, %v1581_v49  }
 0x182   :  { %886 = vperm.xlu1 %1545, %v1583_v50  }
 0x185   :  { %v1585_v11 = vpop.eup %1584  ;;  %1547 = vset.pattern.permute.xlu0 %v1632_v62 }
 0x186   :  { %v870_v53 = vadd.f32 1.0, %v1585_v11 }
 0x187   :  { %v1587_v12 = vpop.eup %1586 }
 0x188   :  { %1592 = vrcp.f32 %v870_v53  ;;  %891 = vperm.xlu1 %1545, %v1587_v12  }
 0x189   :  { %v1589_v54 = vpop.eup %1588 }
 0x18a   :  { %v477_v55 = vadd.f32 1.0, %v1589_v54 }
 0x18b   :  { %v1591_v17 = vpop.eup %1590  ;;  %v988_v56 = vpop.permute.xlu0 %987 }
 0x18c   :  { %1594 = vrcp.f32 %v477_v55  ;;  %v994_v38 = vmul.f32 %v988_v56, %v2164_v0  ;;  %v995_v57 = vmul.f32 %v988_v56, %v2174_v9  ;;  %498 = vperm.xlu1 %1545, %v1591_v17  }
 0x18e   :  { %v998_v58 = vadd.f32 %v994_v38, %v2160_v59  ;;  %v999_v30 = vadd.f32 %v995_v57, %v2160_v59 }
 0x18f   :  { %v992_v4 = vpop.permute.xlu1 %991 }
 0x190   :  { %1596 = vtanh.f32 %v998_v58  ;;  %v996_v62 = vmul.f32 %v992_v4, %v2180_v24  ;;  %v997_v6 = vmul.f32 %v992_v4, %v2188_v37 }
 0x191   :  { %1598 = vtanh.f32 %v999_v30 }
 0x192   :  { %v1593_v52 = vpop.eup %1592  ;;  %v1000_v8 = vadd.f32 %v996_v62, %v2160_v59  ;;  %v1001_v60 = vadd.f32 %v997_v6, %v2160_v59 }
 0x193   :  { %v598_v28 = vpop.permute.xlu1 %597  ;;  %896 = vperm.xlu1 %1545, %v1593_v52  }
 0x194   :  { %1600 = vtanh.f32 %v1000_v8  ;;  %v604_v51 = vmul.f32 %v598_v28, %v2168_v1  ;;  %v605_v15 = vmul.f32 %v598_v28, %v2172_v14 }
 0x195   :  { %1602 = vtanh.f32 %v1001_v60 }
 0x196   :  { %v1595_v21 = vpop.eup %1594  ;;  %v608_v10 = vadd.f32 %v604_v51, %v2162_v3  ;;  %v609_v22 = vadd.f32 %v605_v15, %v2162_v3 }
 0x197   :  { %v602_v5 = vpop.permute.xlu1 %601  ;;  %503 = vperm.xlu1 %1545, %v1595_v21  }
 0x198   :  { %1604 = vtanh.f32 %v608_v10  ;;  %v606_v2 = vmul.f32 %v602_v5, %v2184_v27  ;;  %v607_v23 = vmul.f32 %v602_v5, %v2192_v43 }
 0x199   :  { %1606 = vtanh.f32 %v609_v22 }
 0x19a   :  { %v1597_v47 = vpop.eup %1596  ;;  %v610_v34 = vadd.f32 %v606_v2, %v2162_v3  ;;  %v611_v26 = vadd.f32 %v607_v23, %v2162_v3 }
 0x19b   :  { %v1599_v7 = vpop.eup %1598  ;;  %v1032_v25 = vsel %vm647_vm9, %v1597_v47, -inf  ;;  %v1010_v29 = vsel %vm622_vm10, %v1597_v47, -inf  ;;  %v1054_v31 = vsel %vm672_vm11, %v1597_v47, -inf }
 0x19c   :  { %1608 = vtanh.f32 %v610_v34  ;;  %v1029_v33 = vsel %vm642_vm12, %v1599_v7, -2.0  ;;  %v1007_v35 = vsel %vm617_vm13, %v1599_v7, -2.0  ;;  %v1051_v36 = vsel %vm667_vm14, %v1599_v7, -2.0 }
 0x19d   :  { %1610 = vtanh.f32 %v611_v26  ;;  %v1033_v39 = vsel %vm647_vm9, %v1029_v33, -inf  ;;  %v1011_v40 = vsel %vm622_vm10, %v1007_v35, -inf  ;;  %v1055_v18 = vsel %vm672_vm11, %v1051_v36, -inf }
 0x19e   :  { %v1601_v19 = vpop.eup %1600  ;;  %v1034_v20 = vmax.f32 %v1032_v25, %v1033_v39  ;;  %v1012_v41 = vmax.f32 %v1010_v29, %v1011_v40  ;;  %v1056_v63 = vmax.f32 %v1054_v31, %v1055_v18 }
 0x19f   :  { %v1603_v42 = vpop.eup %1602  ;;  %v1041_v44 = vsel %vm647_vm9, %v1601_v19, -inf  ;;  %v1019_v45 = vsel %vm622_vm10, %v1601_v19, -inf  ;;  %v1063_v46 = vsel %vm672_vm11, %v1601_v19, -inf }
 0x1a0   :  { %v1031_v32 = vsel %vm642_vm12, %v1603_v42, -2.0  ;;  %v1035_v13 = vrot.slane %v1034_v20, 4  ;;  %v1009_v48 = vsel %vm617_vm13, %v1603_v42, -2.0  ;;  %v1013_v49 = vrot.slane %v1012_v41, 4 }
 0x1a1   :  { %v1042_v50 = vsel %vm647_vm9, %v1031_v32, -inf  ;;  %v1020_v11 = vsel %vm622_vm10, %v1009_v48, -inf  ;;  %v1053_v53 = vsel %vm667_vm14, %v1603_v42, -2.0  ;;  %v1057_v12 = vrot.slane %v1056_v63, 4 }
 0x1a2   :  { %v2242_v54 = vpop.eup %1604  ;;  %v1036_v55 = vmax.f32 %v1034_v20, %v1035_v13  ;;  %v1043_v17 = vmax.f32 %v1041_v44, %v1042_v50  ;;  %v1014_v56 = vmax.f32 %v1012_v41, %v1013_v49  ;;  %v1021_v38 = vmax.f32 %v1019_v45, %v1020_v11 }
 0x1a3   :  { %v1607_v57 = vpop.eup %1606  ;;  %v1058_v58 = vmax.f32 %v1056_v63, %v1057_v12  ;;  %v1064_v30 = vsel %vm672_vm11, %v1053_v53, -inf  ;;  %v623_v4 = vsel %vm622_vm10, %v2242_v54, -inf  ;;  %v648_v62 = vsel %vm647_vm9, %v2242_v54, -inf }
 0x1a4   :  { %v1037_v6 = vrot.slane %v1036_v55, 2  ;;  %v1044_v52 = vrot.slane %v1043_v17, 4  ;;  %v1015_v8 = vrot.slane %v1014_v56, 2  ;;  %v1022_v60 = vrot.slane %v1021_v38, 4 }
 0x1a5   :  { %v1059_v28 = vrot.slane %v1058_v58, 2  ;;  %v1065_v51 = vmax.f32 %v1063_v46, %v1064_v30  ;;  %v619_v15 = vsel %vm617_vm13, %v1607_v57, -2.0  ;;  %v644_v21 = vsel %vm642_vm12, %v1607_v57, -2.0 }
 0x1a6   :  { %v2253_v10 = vpop.eup %1608  ;;  %v1038_v22 = vmax.f32 %v1036_v55, %v1037_v6  ;;  %v1045_v5 = vmax.f32 %v1043_v17, %v1044_v52  ;;  %v1016_v2 = vmax.f32 %v1014_v56, %v1015_v8  ;;  %v1023_v23 = vmax.f32 %v1021_v38, %v1022_v60 }
 0x1a7   :  { %v1611_v47 = vpop.eup %1610  ;;  %v1060_v34 = vmax.f32 %v1058_v58, %v1059_v28  ;;  %v1066_v26 = vrot.slane %v1065_v51, 4  ;;  %v624_v7 = vsel %vm622_vm10, %v619_v15, -inf  ;;  %v632_v25 = vsel %vm622_vm10, %v2253_v10, -inf }
 0x1a8   :  { %v1039_v29 = vrot.slane %v1038_v22, 1  ;;  %v1046_v31 = vrot.slane %v1045_v5, 2  ;;  %v1017_v33 = vrot.slane %v1016_v2, 1  ;;  %v1024_v35 = vrot.slane %v1023_v23, 2 }
 0x1a9   :  { %v1061_v36 = vrot.slane %v1060_v34, 1  ;;  %v1067_v39 = vmax.f32 %v1065_v51, %v1066_v26  ;;  %v621_v40 = vsel %vm617_vm13, %v1611_v47, -2.0  ;;  %v625_v18 = vmax.f32 %v623_v4, %v624_v7 }
 0x1aa   :  { %v1040_v19 = vmax.f32 %v1038_v22, %v1039_v29  ;;  %v1047_v20 = vmax.f32 %v1045_v5, %v1046_v31  ;;  %v1018_v41 = vmax.f32 %v1016_v2, %v1017_v33  ;;  %v1025_v63 = vmax.f32 %v1023_v23, %v1024_v35 }
 0x1ab   :  { %v1062_v42 = vmax.f32 %v1060_v34, %v1061_v36  ;;  %v1068_v44 = vrot.slane %v1067_v39, 2  ;;  %v626_v45 = vrot.slane %v625_v18, 4  ;;  %v633_v46 = vsel %vm622_vm10, %v621_v40, -inf }
 0x1ac   :  { %v1048_v32 = vrot.slane %v1047_v20, 1  ;;  %v1026_v13 = vrot.slane %v1025_v63, 1  ;;  %v634_v48 = vmax.f32 %v632_v25, %v633_v46  ;;  %v646_v49 = vsel %vm642_vm12, %v1611_v47, -2.0 }
 0x1ad   :  { %v1069_v50 = vmax.f32 %v1067_v39, %v1068_v44  ;;  %v627_v11 = vmax.f32 %v625_v18, %v626_v45  ;;  %v649_v53 = vsel %vm647_vm9, %v644_v21, -inf  ;;  %v657_v12 = vsel %vm647_vm9, %v2253_v10, -inf }
 0x1ae   :  { %v1049_v55 = vmax.f32 %v1047_v20, %v1048_v32  ;;  %v1027_v17 = vmax.f32 %v1025_v63, %v1026_v13  ;;  %v635_v56 = vrot.slane %v634_v48, 4  ;;  %v650_v38 = vmax.f32 %v648_v62, %v649_v53  ;;  %v1103_v13 = vld [vmem:[%s2383_s4] sm:$0xff] }
 0x1af   :  { %v1070_v58 = vrot.slane %v1069_v50, 1  ;;  %v628_v30 = vrot.slane %v627_v11, 2  ;;  %v658_v4 = vsel %vm647_vm9, %v646_v49, -inf  ;;  %v669_v6 = vsel %vm667_vm14, %v1607_v57, -2.0 }
 0x1b0   :  { %v1086_v52 = vsel %vm693_vm15, %v1049_v55, %v1040_v19  ;;  %v1080_v8 = vsel %vm693_vm15, %v1027_v17, %v1018_v41  ;;  %v636_v60 = vmax.f32 %v634_v48, %v635_v56  ;;  %v651_v28 = vrot.slane %v650_v38, 4  ;;  %v1104_v48 = vld [vmem:[%s2383_s4 + $0x8] sm:$0xff] }
 0x1b1   :  { %1087 = vrot.lane.b32.xlu0 %v1086_v52, %s1634_s2  ;;  %1081 = vrot.lane.b32.xlu1 %v1080_v8, %s1634_s2  ;;  %v1071_v51 = vmax.f32 %v1069_v50, %v1070_v58  ;;  %v629_v62 = vmax.f32 %v627_v11, %v628_v30  ;;  %v659_v15 = vmax.f32 %v657_v12, %v658_v4  ;;  %v671_v21 = vsel %vm667_vm14, %v1611_v47, -2.0 }
 0x1b2   :  { %v637_v22 = vrot.slane %v636_v60, 2  ;;  %v652_v5 = vmax.f32 %v650_v38, %v651_v28  ;;  %v673_v57 = vsel %vm672_vm11, %v2242_v54, -inf  ;;  %v674_v2 = vsel %vm672_vm11, %v669_v6, -inf }
 0x1b3   :  { %v1092_v23 = vsel %vm693_vm15, %v1071_v51, %v1062_v42  ;;  %v630_v34 = vrot.slane %v629_v62, 1  ;;  %v660_v26 = vrot.slane %v659_v15, 4  ;;  %v675_v7 = vmax.f32 %v673_v57, %v674_v2 }
 0x1b4   :  { %v638_v25 = vmax.f32 %v636_v60, %v637_v22  ;;  %v653_v29 = vrot.slane %v652_v5, 2  ;;  %v682_v31 = vsel %vm672_vm11, %v2253_v10, -inf  ;;  %v683_v16 = vsel %vm672_vm11, %v671_v21, -inf }
 0x1b5   :  { %1093 = vrot.lane.b32.xlu1 %v1092_v23, %s1634_s2  ;;  %v661_v47 = vmax.f32 %v659_v15, %v660_v26  ;;  %v676_v33 = vrot.slane %v675_v7, 4  ;;  %v684_v35 = vmax.f32 %v682_v31, %v683_v16  ;;  %v631_v19 = vmax.f32 %v629_v62, %v630_v34 }
 0x1b6   :  { %v639_v54 = vrot.slane %v638_v25, 1  ;;  %v654_v36 = vmax.f32 %v652_v5, %v653_v29  ;;  %v1462_v49 = vpack.c.bf16 %v1104_v48, %v1103_v13 }
 0x1b7   :  { %v662_v39 = vrot.slane %v661_v47, 2  ;;  %v677_v40 = vmax.f32 %v675_v7, %v676_v33  ;;  %v685_v18 = vrot.slane %v684_v35, 4 }
 0x1b8   :  { %v640_v20 = vmax.f32 %v638_v25, %v639_v54  ;;  %v655_v41 = vrot.slane %v654_v36, 1  ;;  %1463 = vmatpush3.bf16.msra.mxu0 %v1462_v49  ;;  %v1105_v49 = vld [vmem:[%s2383_s4 + $0x10] sm:$0xff] }
 0x1b9   :  { %v663_v63 = vmax.f32 %v661_v47, %v662_v39  ;;  %v678_v42 = vrot.slane %v677_v40, 2  ;;  %v686_v44 = vmax.f32 %v684_v35, %v685_v18  ;;  %1464 = vmatprep.subr.bf16.mxu0 %v1631_v61 }
 0x1ba   :  { %v700_v10 = vsel %vm693_vm15, %v640_v20, %v631_v19  ;;  %v656_v50 = vmax.f32 %v654_v36, %v655_v41 }
 0x1bb   :  { %701 = vrot.lane.b32.xlu0 %v700_v10, %s1634_s2  ;;  %v664_v45 = vrot.slane %v663_v63, 1  ;;  %v679_v46 = vmax.f32 %v677_v40, %v678_v42  ;;  %v687_v32 = vrot.slane %v686_v44, 2 }
 0x1bd   :  { %v665_v11 = vmax.f32 %v663_v63, %v664_v45  ;;  %v680_v53 = vrot.slane %v679_v46, 1  ;;  %v688_v12 = vmax.f32 %v686_v44, %v687_v32 }
 0x1bf   :  { %v2292_v55 = vsel %vm693_vm15, %v665_v11, %v656_v50  ;;  %v689_v17 = vrot.slane %v688_v12, 1  ;;  %v681_v56 = vmax.f32 %v679_v46, %v680_v53  ;;  %v1106_v50 = vld [vmem:[%s2383_s4 + $0x18] sm:$0xff] }
 0x1c1   :  { %v690_v38 = vmax.f32 %v688_v12, %v689_v17  ;;  %v1465_v12 = vpack.c.bf16 %v1106_v50, %v1105_v49 }
 0x1c3   :  { %v2296_v58 = vsel %vm693_vm15, %v690_v38, %v681_v56  ;;  %1466 = vmatpush3.bf16.msra.mxu0 %v1465_v12 }
 0x1f5   :  { %v882_v30 = vpop.permute.xlu1 %881 }
 0x1f6   :  { %v899_v6 = vmul.f32 %v882_v30, %v2164_v0 }
 0x1f8   :  { %v903_v8 = vadd.f32 %v899_v6, %v2160_v59  ;;  %v1107_v6 = vld [vmem:[%s2383_s4 + $0x20] sm:$0xff] }
 0x1f9   :  { %v489_v4 = vpop.permute.xlu1 %488 }
 0x1fa   :  { %v506_v52 = vmul.f32 %v489_v4, %v2168_v1  ;;  %1612 = vtanh.f32 %v903_v8  ;;  %v1635_v4 = vmov 0.0  }
 0x1fb   :  { %1365 = vmatprep.subr.mxu0 %v1635_v4  ;;  %1367 = vmatprep.mubr.msk.f32.mxu0 %vm1636_vm2, %v1635_v4 }
 0x1fc   :  { %v510_v60 = vadd.f32 %v506_v52, %v2162_v3  ;;  %1366 = vmatpush3.msra.mxu0 %v1107_v6  ;;  %1386 = vmatprep.mubr.msk.f32.mxu1 %vm1636_vm2, %v1635_v4 }
 0x1fe   :  { %1614 = vtanh.f32 %v510_v60 }
 0x200   :  { %v494_v28 = vpop.permute.xlu0 %493 }
 0x201   :  { %v507_v51 = vmul.f32 %v494_v28, %v2172_v14  ;;  %v887_v62 = vpop.permute.xlu1 %886 }
 0x202   :  { %v900_v15 = vmul.f32 %v887_v62, %v2174_v9 }
 0x203   :  { %v511_v21 = vadd.f32 %v507_v51, %v2162_v3 }
 0x204   :  { %v904_v22 = vadd.f32 %v900_v15, %v2160_v59  ;;  %v1613_v1 = vpop.eup %1612  ;;  %v1190_v15 = vld [vmem:[%s2384_s6] sm:$0xff] }
 0x205   :  { %1616 = vtanh.f32 %v511_v21  ;;  %v911_v34 = vsel %vm518_vm1, %v1613_v1, -inf  ;;  %v1191_v21 = vld [vmem:[%s2384_s6 + $0x8] sm:$0xff] }
 0x206   :  { %1618 = vtanh.f32 %v904_v22  ;;  %v1192_v22 = vld [vmem:[%s2384_s6 + $0x10] sm:$0xff] }
 0x207   :  { %v892_v0 = vpop.permute.xlu1 %891 }
 0x208   :  { %v1615_v5 = vpop.eup %1614  ;;  %v901_v57 = vmul.f32 %v892_v0, %v2180_v24 }
 0x209   :  { %v519_v9 = vsel %vm518_vm1, %v1615_v5, -inf  ;;  %v1468_v5 = vpack.c.bf16 %v1191_v21, %v1190_v15 }
 0x20a   :  { %v905_v7 = vadd.f32 %v901_v57, %v2160_v59  ;;  %v1193_v57 = vld [vmem:[%s2384_s6 + $0x18] sm:$0xff] }
 0x20b   :  { %v499_v2 = vpop.permute.xlu1 %498  ;;  %1469 = vmatpush3.bf16.msra.mxu1 %v1468_v5 }
 0x20c   :  { %v508_v25 = vmul.f32 %v499_v2, %v2184_v27  ;;  %1620 = vtanh.f32 %v905_v7  ;;  %1470 = vmatprep.subr.bf16.mxu1 %v1631_v61 }
 0x20e   :  { %v512_v33 = vadd.f32 %v508_v25, %v2162_v3 }
 0x20f   :  { %v1617_v23 = vpop.eup %1616 }
 0x210   :  { %v1619_v14 = vpop.eup %1618  ;;  %v520_v26 = vsel %vm518_vm1, %v1617_v23, -inf }
 0x211   :  { %v912_v29 = vsel %vm518_vm1, %v1619_v14, -inf  ;;  %v521_v31 = vmax.f32 %v519_v9, %v520_v26  ;;  %v1471_v14 = vpack.c.bf16 %v1193_v57, %v1192_v22  ;;  %v1195_v9 = vld [vmem:[%s2384_s6 + $0x28] sm:$0xff] }
 0x212   :  { %v897_v16 = vpop.permute.xlu1 %896  ;;  %v913_v47 = vmax.f32 %v911_v34, %v912_v29  ;;  %v1194_v34 = vld [vmem:[%s2384_s6 + $0x20] sm:$0xff] }
 0x213   :  { %v902_v24 = vmul.f32 %v897_v16, %v2188_v37  ;;  %v522_v19 = vrot.slane %v521_v31, 4  ;;  %1472 = vmatpush3.bf16.msra.mxu1 %v1471_v14  ;;  %v1474_v7 = vpack.c.bf16 %v1195_v9, %v1194_v34 }
 0x214   :  { %v914_v27 = vrot.slane %v913_v47, 4  ;;  %1473 = vmatprep.subr.bf16.mxu1 %v1631_v61 }
 0x215   :  { %v906_v35 = vadd.f32 %v902_v24, %v2160_v59  ;;  %v523_v44 = vmax.f32 %v521_v31, %v522_v19  ;;  %v1197_v19 = vld [vmem:[%s2384_s6 + $0x38] sm:$0xff] }
 0x216   :  { %v504_v54 = vpop.permute.xlu1 %503  ;;  %v1621_v40 = vpop.eup %1620  ;;  %v915_v18 = vmax.f32 %v913_v47, %v914_v27 }
 0x217   :  { %1622 = vtanh.f32 %v906_v35  ;;  %v509_v36 = vmul.f32 %v504_v54, %v2192_v43  ;;  %v920_v37 = vsel %vm518_vm1, %v1621_v40, -inf  ;;  %v524_v13 = vrot.slane %v523_v44, 2  ;;  %1475 = vmatpush3.bf16.msra.mxu1 %v1474_v7 }
 0x218   :  { %1624 = vtanh.f32 %v512_v33  ;;  %v916_v42 = vrot.slane %v915_v18, 2  ;;  %1476 = vmatprep.subr.bf16.mxu1 %v1631_v61 }
 0x219   :  { %v513_v39 = vadd.f32 %v509_v36, %v2162_v3  ;;  %v525_v38 = vmax.f32 %v523_v44, %v524_v13  ;;  %v1340_v44 = vld [vmem:[%s2386_s7] ss:$0 sm:$0xff] }
 0x21a   :  { %v917_v46 = vmax.f32 %v915_v18, %v916_v42  ;;  %v1196_v18 = vld [vmem:[%s2384_s6 + $0x30] sm:$0xff] }
 0x21b   :  { %1626 = vtanh.f32 %v513_v39  ;;  %v526_v51 = vrot.slane %v525_v38, 1 }
 0x21c   :  { %v918_v17 = vrot.slane %v917_v46, 1 }
 0x21d   :  { %v527_v2 = vmax.f32 %v525_v38, %v526_v51 }
 0x21e   :  { %v919_v60 = vmax.f32 %v917_v46, %v918_v17 }
 0x221   :  { %v1623_v20 = vpop.eup %1622 }
 0x222   :  { %v921_v41 = vsel %vm518_vm1, %v1623_v20, -inf  ;;  %v1625_v63 = vpop.eup %1624  ;;  %v1477_v20 = vpack.c.bf16 %v1197_v19, %v1196_v18 }
 0x223   :  { %v922_v59 = vmax.f32 %v920_v37, %v921_v41  ;;  %v528_v43 = vsel %vm518_vm1, %v1625_v63, -inf  ;;  %v1088_v25 = vpop.permute.xlu0 %1087  ;;  %v1082_v29 = vpop.permute.xlu1 %1081  ;;  %v1338_v37 = vld [vmem:[%s2385_s5] ss:$0 sm:$0xff] }
 0x224   :  { %1478 = vmatpush3.bf16.msra.mxu1 %v1477_v20 }
 0x225   :  { %v1627_v10 = vpop.eup %1626  ;;  %v923_v45 = vrot.slane %v922_v59, 4 }
 0x226   :  { %v529_v3 = vsel %vm518_vm1, %v1627_v10, -inf }
 0x227   :  { %v924_v32 = vmax.f32 %v922_v59, %v923_v45  ;;  %v530_v48 = vmax.f32 %v528_v43, %v529_v3  ;;  %v1094_v16 = vpop.permute.xlu1 %1093 }
 0x229   :  { %v925_v11 = vrot.slane %v924_v32, 2  ;;  %v531_v53 = vrot.slane %v530_v48, 4 }
 0x22b   :  { %v926_v56 = vmax.f32 %v924_v32, %v925_v11  ;;  %v532_v30 = vmax.f32 %v530_v48, %v531_v53 }
 0x22d   :  { %v927_v52 = vrot.slane %v926_v56, 1  ;;  %v533_v8 = vrot.slane %v532_v30, 2  ;;  %v702_v31 = vpop.permute.xlu0 %701 }
 0x22f   :  { %v928_v28 = vmax.f32 %v926_v56, %v927_v52  ;;  %v534_v62 = vmax.f32 %v532_v30, %v533_v8 }
 0x231   :  { %v1074_v0 = vsel %vm693_vm15, %v928_v28, %v919_v60  ;;  %v535_v1 = vrot.slane %v534_v62, 1 }
 0x232   :  { %1075 = vrot.lane.b32.xlu0 %v1074_v0, %s1634_s2 }
 0x233   :  { %v536_v23 = vmax.f32 %v534_v62, %v535_v1 }
 0x235   :  { %v694_v26 = vsel %vm693_vm15, %v536_v23, %v527_v2 }
 0x236   :  { %707 = vrot.lane.b32.xlu0 %v2292_v55, %s1634_s2  ;;  %695 = vrot.lane.b32.xlu1 %v694_v26, %s1634_s2 }
 0x23a   :  { %713 = vrot.lane.b32.xlu1 %v2296_v58, %s1634_s2 }
 0x2a4   :  { %v1076_v47 = vpop.permute.xlu0 %1075 }
 0x2a5   :  { %v1096_v55 = vsel %vm716_vm3, %v1076_v47, %v1082_v29 }
 0x2a6   :  { %v1097_v24 = vsel %vm718_vm4, %v1096_v55, %v1088_v25 }
 0x2a7   :  { %v1098_v35 = vsel %vm295_vm5, %v1097_v24, %v1094_v16 }
 0x2a8   :  { %v696_v33 = vpop.permute.xlu1 %695  ;;  %v708_v54 = vpop.permute.xlu0 %707  ;;  %v1100_v39 = vrot.slane %v1098_v35, 6 }
 0x2a9   :  { %v717_v36 = vsel %vm716_vm3, %v696_v33, %v702_v31 }
 0x2aa   :  { %v719_v27 = vsel %vm718_vm4, %v717_v36, %v708_v54 }
 0x2ac   :  { %v714_v58 = vpop.permute.xlu1 %713 }
 0x2ad   :  { %v720_v61 = vsel %vm295_vm5, %v719_v27, %v714_v58 }
 0x2ae   :  { %v1102_v40 = vsel %vm45_vm0, %v720_v61, %v1100_v39  ;;  %vm1282_vm0 = vcmask 123904  }
 0x2af   :  { %1368 = vmatmul.mubr.msk.f32.vlgmr.msra.gmra.mrb[8].mxu0 %vm1115_vm6, %v1102_v40 }
 0x382   :  { %v1185_v41 = vpop.f32.mrb[8].mxu0 }
 0x383   :  { %v1186_v63 = vadd.f32 %v1338_v37, %v1185_v41  ;;  %v1369_v42 = vpop.f32.mrb[9].mxu0 }
 0x385   :  { %v1189_v59 = vmax.f32 %v1186_v63, 0.0 }
 0x387   :  { %1387 = vmatmul.mubr.msk.f32.vlgmr.msra.gmra.mrb[8].mxu1 %vm304_vm7, %v1189_v59 }
 0x45a   :  { %v1274_v10 = vpop.f32.mrb[8].mxu1 }
 0x45b   :  { %v1275_v45 = vadd.f32 %v1340_v44, %v1274_v10  ;;  %v1388_v43 = vpop.f32.mrb[9].mxu1 }
 0x45d   :  { %v1279_v3 = vrot.slane %v1275_v45, 2 }
 0x45f   :  { %v1281_v46 = vmul.f32 %v1279_v3, %v1275_v45 }
 0x461   :  { %v1283_v32 = vsel %vm1282_vm0, %v1281_v46, 0.0 }
 0x462   :  { %1284 = vadd.xlane.f32.xlu0 %v1283_v32 }
 0x4ef   :  { %v1285_v13 = vpop.xlane.xlu0 %1284 }
 0x4f0   :  { %1286 = vst [vmem:[%s2387_s8] sm:$0x3] %v1285_v13 }

</bundles_post_ra>
